<compile_context>
chip_gen: v7x
topology: tpu7x:2x2x1
jax: 0.10.0
libtpu: 0.0.40
codegen_flags: <defaults>
</compile_context>

<pallas_src>
import functools

import jax
import jax.numpy as jnp
from jax.experimental import pallas as pl
from jax.experimental.pallas import tpu as pltpu

IDIM_1 = 512
IDIM_2 = 512
HDIM = 512


def _round_up(x, n):
    return ((x + n - 1) // n) * n


def _sublane_multiple(dtype):
    """Minimum row (sublane) multiple for a given dtype: 8 for 4-byte,
    16 for 2-byte, 32 for 1-byte element types."""
    return max(8, 32 // jnp.dtype(dtype).itemsize)


@functools.lru_cache(maxsize=1)
def _default_tile_and_vmem():
    """Pick (tm, vmem_limit_bytes) from the chip's VMEM capacity:
    v5e/v6e (128 MiB VMEM) -> tm=1024, 64 MiB scoped limit;
    v7x (64 MiB VMEM)      -> tm=512, 32 MiB scoped limit.
    Falls back to the conservative v7x setting if the query fails."""
    try:
        vmem = pltpu.get_tpu_info().vmem_capacity_bytes
    except Exception:  # conservative fallback
        vmem = 64 * 1024 * 1024
    if vmem >= 100 * 1024 * 1024:
        return 1024, 64 * 1024 * 1024
    return 512, 32 * 1024 * 1024


def _choose_row_tile(m, tm_cap, sublane):
    """Pick the row-tile size.

    * Round to the dtype-correct sublane multiple.
    * Tiny inputs (<=128 rows) run as a single block.
    * Otherwise produce at least 2 grid steps (when everything would fit in a
      single block) so 'parallel' semantics can shard rows across v7x's 2 TCs.
    """
    tm_cap = max((tm_cap // sublane) * sublane, sublane)
    m_pad = _round_up(m, sublane)
    if m_pad <= max(128, sublane):
        return min(m_pad, tm_cap)
    tm = min(tm_cap, _round_up(pl.cdiv(m_pad, 2), sublane))
    return max(tm, sublane)


def _hadamard_kernel(x1_ref, x2_ref, w1_ref, b1_ref, w2_ref, b2_ref,
                     w3_ref, b3_ref, o_ref):
    cdt = w1_ref.dtype  # matmul compute dtype (bf16 by default, f32 for debug)

    # h1 = relu(x1 @ W1 + b1)   (bias add / relu in f32)
    x1 = x1_ref[...].astype(cdt)
    h1 = jnp.dot(x1, w1_ref[...], preferred_element_type=jnp.float32)
    h1 = jnp.maximum(h1 + b1_ref[...], 0.0)

    # h2 = relu(x2 @ W2 + b2)
    x2 = x2_ref[...].astype(cdt)
    h2 = jnp.dot(x2, w2_ref[...], preferred_element_type=jnp.float32)
    h2 = jnp.maximum(h2 + b2_ref[...], 0.0)

    # out = sigmoid((h1 * h2) @ W3 + b3)
    h = (h1 * h2).astype(cdt)
    y = jnp.dot(h, w3_ref[...], preferred_element_type=jnp.float32)
    y = y + b3_ref[...]
    o_ref[...] = jax.nn.sigmoid(y).astype(o_ref.dtype)


@functools.partial(jax.jit, static_argnames=("tm", "vmem_limit_bytes"))
def _hadamard_product_impl(x1, x2, prepared_params, *, tm, vmem_limit_bytes):
    assert x1.shape == x2.shape
    assert x1.shape[-1] == IDIM_1 and x2.shape[-1] == IDIM_2

    lead_shape = x1.shape[:-1]
    x1_2d = x1.reshape(-1, IDIM_1)
    x2_2d = x2.reshape(-1, IDIM_2)
    m = x1_2d.shape[0]

    # Output dtype follows the activation dtype (bf16 in, bf16 out) — no
    # extra HBM cast pass in the wrapper.
    out_dtype = x1.dtype

    # Dtype-correct sublane rounding (8 for f32, 16 for bf16, 32 for 8-bit).
    sublane = max(_sublane_multiple(x1.dtype),
                  _sublane_multiple(x2.dtype),
                  _sublane_multiple(out_dtype))
    tm_eff = _choose_row_tile(m, tm, sublane)
    grid = (pl.cdiv(m, tm_eff),)

    w1_t, b1_r, w2_t, b2_r, w3_t, b3_r = prepared_params

    row_spec = pl.BlockSpec((tm_eff, IDIM_1), lambda i: (i, 0))
    out_spec = pl.BlockSpec((tm_eff, HDIM), lambda i: (i, 0))
    # Constant index_map -> never re-DMA'd; single-buffer to save VMEM.
    weight_spec = pl.BlockSpec((IDIM_1, HDIM), lambda i: (0, 0),
                               pipeline_mode=pl.Buffered(1))
    bias_spec = pl.BlockSpec((1, HDIM), lambda i: (0, 0),
                             pipeline_mode=pl.Buffered(1))

    # Scheduling hint for XLA: 3 GEMM passes + elementwise, sigmoid EUP work,
    # and the actual HBM traffic (activations + output + resident params).
    itemsize = lambda a: jnp.dtype(a.dtype).itemsize
    bytes_accessed = (m * IDIM_1 * itemsize(x1_2d) + m * IDIM_2 * itemsize(x2_2d)
                      + m * HDIM * jnp.dtype(out_dtype).itemsize
                      + 3 * IDIM_1 * HDIM * itemsize(w1_t)
                      + 3 * HDIM * 4)
    cost = pl.CostEstimate(
        flops=3 * 2 * m * IDIM_1 * HDIM + 5 * m * HDIM,
        transcendentals=m * HDIM,
        bytes_accessed=int(bytes_accessed))

    out = pl.pallas_call(
        _hadamard_kernel,
        out_shape=jax.ShapeDtypeStruct((m, HDIM), out_dtype),
        grid_spec=pltpu.PrefetchScalarGridSpec(
            num_scalar_prefetch=0,
            grid=grid,
            in_specs=[row_spec, row_spec,
                      weight_spec, bias_spec,
                      weight_spec, bias_spec,
                      weight_spec, bias_spec],
            out_specs=out_spec,
        ),
        compiler_params=pltpu.CompilerParams(
            dimension_semantics=("parallel",),   # shards rows across v7x's 2 TCs
            vmem_limit_bytes=vmem_limit_bytes),
        cost_estimate=cost,
    )(x1_2d, x2_2d, w1_t, b1_r, w2_t, b2_r, w3_t, b3_r)

    return out.reshape(*lead_shape, HDIM)


def hadamard_product(x1, x2, prepared_params, *, tm=None, vmem_limit_bytes=None):
    """Pallas implementation of HadamardProduct.forward((x1, x2)).

    `prepared_params` must come from prepare_params() (weights pre-transposed
    to (in, out) and cast to the compute dtype, biases reshaped to (1, HDIM)).
    tm / vmem_limit_bytes default to generation-appropriate values.
    """
    if tm is None or vmem_limit_bytes is None:
        tm_d, vmem_d = _default_tile_and_vmem()
        tm = tm_d if tm is None else tm
        vmem_limit_bytes = vmem_d if vmem_limit_bytes is None else vmem_limit_bytes
    return _hadamard_product_impl(x1, x2, prepared_params,
                                  tm=tm, vmem_limit_bytes=vmem_limit_bytes)


def prepare_params(params, compute_dtype=jnp.bfloat16):
    """One-time param prep: transpose PyTorch (out,in) weights to (in,out),
    cast them to the matmul compute dtype, reshape biases to (1, HDIM) f32.
    Call once and reuse — keeps the per-call jit path free of transposes.
    Always use the bf16 compute dtype in production; the f32 path is a
    reference/debug path only (multi-pass f32 matmul on the MXU is slow)."""
    w1, b1, w2, b2, w3, b3 = params
    prep_w = lambda w: jnp.asarray(w.T, dtype=compute_dtype)
    prep_b = lambda b: jnp.asarray(b, dtype=jnp.float32).reshape(1, HDIM)
    return (prep_w(w1), prep_b(b1), prep_w(w2), prep_b(b2),
            prep_w(w3), prep_b(b3))


def init_params(key):
    """Deterministic init mimicking nn.Linear default (U(-1/sqrt(in), 1/sqrt(in)))."""
    keys = jax.random.split(key, 6)

    def linear(kw, kb, out_dim, in_dim):
        bound = 1.0 / jnp.sqrt(in_dim)
        w = jax.random.uniform(kw, (out_dim, in_dim), jnp.float32, -bound, bound)
        b = jax.random.uniform(kb, (out_dim,), jnp.float32, -bound, bound)
        return w, b

    w1, b1 = linear(keys[0], keys[1], HDIM, IDIM_1)
    w2, b2 = linear(keys[2], keys[3], HDIM, IDIM_2)
    w3, b3 = linear(keys[4], keys[5], HDIM, HDIM)
    return (w1, b1, w2, b2, w3, b3)


def reference(x1, x2, params):
    w1, b1, w2, b2, w3, b3 = params
    h1 = jax.nn.relu(x1 @ w1.T + b1)
    h2 = jax.nn.relu(x2 @ w2.T + b2)
    return jax.nn.sigmoid((h1 * h2) @ w3.T + b3)


if __name__ == "__main__":
    key = jax.random.PRNGKey(0)
    kp, k1, k2 = jax.random.split(key, 3)

    params = init_params(kp)
    prep_bf16 = prepare_params(params, compute_dtype=jnp.bfloat16)

    # --- Small shapes: batch=2, seq=8; feature dims fixed at 512 by the module.
    # bf16 end-to-end (producer emits bf16; output comes back bf16).
    batch, seq = 2, 8
    x1_f32 = jax.random.normal(k1, (batch, seq, IDIM_1), jnp.float32)
    x2_f32 = jax.random.normal(k2, (batch, seq, IDIM_2), jnp.float32)
    x1_bf = x1_f32.astype(jnp.bfloat16)
    x2_bf = x2_f32.astype(jnp.bfloat16)

    ref_bf = reference(x1_bf.astype(jnp.float32), x2_bf.astype(jnp.float32), params)
    out = jax.block_until_ready(hadamard_product(x1_bf, x2_bf, prep_bf16))
    assert out.shape == (batch, seq, HDIM), out.shape
    assert out.dtype == jnp.bfloat16, out.dtype
    max_err = float(jnp.max(jnp.abs(out.astype(jnp.float32) - ref_bf)))
    assert max_err < 3e-2, max_err  # bf16 matmul inputs + bf16 output quantization

    # --- Mid-size M (= 300 rows): exercises the >=2-step grid (both v7x TCs
    # get a block) and the masked ragged last row-block.
    x1m = jax.random.normal(k1, (2, 150, IDIM_1), jnp.float32).astype(jnp.bfloat16)
    x2m = jax.random.normal(k2, (2, 150, IDIM_2), jnp.float32).astype(jnp.bfloat16)
    refm = reference(x1m.astype(jnp.float32), x2m.astype(jnp.float32), params)
    outm = jax.block_until_ready(hadamard_product(x1m, x2m, prep_bf16))
    assert outm.shape == (2, 150, HDIM), outm.shape
    assert float(jnp.max(jnp.abs(outm.astype(jnp.float32) - refm))) < 3e-2

    # --- Pure-f32 debug path matches the PyTorch-style reference tightly.
    prep_f32 = prepare_params(params, compute_dtype=jnp.float32)
    ref_f32 = reference(x1_f32, x2_f32, params)
    out_f32 = jax.block_until_ready(hadamard_product(x1_f32, x2_f32, prep_f32))
    assert jnp.allclose(out_f32, ref_f32, atol=1e-5, rtol=1e-5), (
        float(jnp.max(jnp.abs(out_f32 - ref_f32))))

    print("KERNEL_OK")
</pallas_src>

<mosaic_0001>
module attributes {stable_mosaic.version = 11 : i64} {
  func.func @_hadamard_kernel(%arg0: i32, %arg1: memref<16x512xbf16, #tpu.memory_space<vmem>>, %arg2: memref<16x512xbf16, #tpu.memory_space<vmem>>, %arg3: memref<512x512xbf16, #tpu.memory_space<vmem>>, %arg4: memref<1x512xf32, #tpu.memory_space<vmem>>, %arg5: memref<512x512xbf16, #tpu.memory_space<vmem>>, %arg6: memref<1x512xf32, #tpu.memory_space<vmem>>, %arg7: memref<512x512xbf16, #tpu.memory_space<vmem>>, %arg8: memref<1x512xf32, #tpu.memory_space<vmem>>, %arg9: memref<16x512xbf16, #tpu.memory_space<vmem>>) attributes {dimension_semantics = [#tpu.dimension_semantics<parallel>], iteration_bounds = array<i64: 1>, scalar_prefetch = 0 : i64, scratch_operands = 0 : i64, tpu.core_type = #tpu.core_type<tc>, window_params = [{transform_indices = @transform_0, window_bounds = array<i64: 16, 512>}, {transform_indices = @transform_1, window_bounds = array<i64: 16, 512>}, {pipeline_mode = #tpu.pipeline_mode<synchronous>, transform_indices = @transform_2, window_bounds = array<i64: 512, 512>}, {pipeline_mode = #tpu.pipeline_mode<synchronous>, transform_indices = @transform_3, window_bounds = array<i64: 1, 512>}, {pipeline_mode = #tpu.pipeline_mode<synchronous>, transform_indices = @transform_4, window_bounds = array<i64: 512, 512>}, {pipeline_mode = #tpu.pipeline_mode<synchronous>, transform_indices = @transform_5, window_bounds = array<i64: 1, 512>}, {pipeline_mode = #tpu.pipeline_mode<synchronous>, transform_indices = @transform_6, window_bounds = array<i64: 512, 512>}, {pipeline_mode = #tpu.pipeline_mode<synchronous>, transform_indices = @transform_7, window_bounds = array<i64: 1, 512>}, {transform_indices = @transform_8, window_bounds = array<i64: 16, 512>}]} {
    %c0 = arith.constant 0 : index
    %c0_0 = arith.constant 0 : index
    %0 = vector.load %arg1[%c0, %c0_0] : memref<16x512xbf16, #tpu.memory_space<vmem>>, vector<16x512xbf16>
    %c0_1 = arith.constant 0 : index
    %c0_2 = arith.constant 0 : index
    %1 = vector.load %arg3[%c0_1, %c0_2] : memref<512x512xbf16, #tpu.memory_space<vmem>>, vector<512x512xbf16>
    %cst = arith.constant dense<0.000000e+00> : vector<16x512xf32>
    %2 = tpu.matmul %0, %1, %cst {dimension_numbers = #tpu.dot_dimension_numbers<[1], [0], [0], [1], [0, 0, 1, 1], [], []>} : vector<16x512xbf16>, vector<512x512xbf16>, vector<16x512xf32> -> vector<16x512xf32>
    %c0_3 = arith.constant 0 : index
    %c0_4 = arith.constant 0 : index
    %3 = vector.load %arg4[%c0_3, %c0_4] : memref<1x512xf32, #tpu.memory_space<vmem>>, vector<1x512xf32>
    %4 = vector.broadcast %3 : vector<1x512xf32> to vector<16x512xf32>
    %5 = arith.addf %2, %4 : vector<16x512xf32>
    %cst_5 = arith.constant 0.000000e+00 : f32
    %6 = vector.broadcast %cst_5 : f32 to vector<16x512xf32>
    %7 = arith.maximumf %5, %6 : vector<16x512xf32>
    %c0_6 = arith.constant 0 : index
    %c0_7 = arith.constant 0 : index
    %8 = vector.load %arg2[%c0_6, %c0_7] : memref<16x512xbf16, #tpu.memory_space<vmem>>, vector<16x512xbf16>
    %c0_8 = arith.constant 0 : index
    %c0_9 = arith.constant 0 : index
    %9 = vector.load %arg5[%c0_8, %c0_9] : memref<512x512xbf16, #tpu.memory_space<vmem>>, vector<512x512xbf16>
    %cst_10 = arith.constant dense<0.000000e+00> : vector<16x512xf32>
    %10 = tpu.matmul %8, %9, %cst_10 {dimension_numbers = #tpu.dot_dimension_numbers<[1], [0], [0], [1], [0, 0, 1, 1], [], []>} : vector<16x512xbf16>, vector<512x512xbf16>, vector<16x512xf32> -> vector<16x512xf32>
    %c0_11 = arith.constant 0 : index
    %c0_12 = arith.constant 0 : index
    %11 = vector.load %arg6[%c0_11, %c0_12] : memref<1x512xf32, #tpu.memory_space<vmem>>, vector<1x512xf32>
    %12 = vector.broadcast %11 : vector<1x512xf32> to vector<16x512xf32>
    %13 = arith.addf %10, %12 : vector<16x512xf32>
    %cst_13 = arith.constant 0.000000e+00 : f32
    %14 = vector.broadcast %cst_13 : f32 to vector<16x512xf32>
    %15 = arith.maximumf %13, %14 : vector<16x512xf32>
    %16 = arith.mulf %7, %15 : vector<16x512xf32>
    %17 = arith.truncf %16 : vector<16x512xf32> to vector<16x512xbf16>
    %c0_14 = arith.constant 0 : index
    %c0_15 = arith.constant 0 : index
    %18 = vector.load %arg7[%c0_14, %c0_15] : memref<512x512xbf16, #tpu.memory_space<vmem>>, vector<512x512xbf16>
    %cst_16 = arith.constant dense<0.000000e+00> : vector<16x512xf32>
    %19 = tpu.matmul %17, %18, %cst_16 {dimension_numbers = #tpu.dot_dimension_numbers<[1], [0], [0], [1], [0, 0, 1, 1], [], []>} : vector<16x512xbf16>, vector<512x512xbf16>, vector<16x512xf32> -> vector<16x512xf32>
    %c0_17 = arith.constant 0 : index
    %c0_18 = arith.constant 0 : index
    %20 = vector.load %arg8[%c0_17, %c0_18] : memref<1x512xf32, #tpu.memory_space<vmem>>, vector<1x512xf32>
    %21 = vector.broadcast %20 : vector<1x512xf32> to vector<16x512xf32>
    %22 = arith.addf %19, %21 : vector<16x512xf32>
    %23 = arith.negf %22 : vector<16x512xf32>
    %24 = math.exp %23 : vector<16x512xf32>
    %cst_19 = arith.constant 1.000000e+00 : f32
    %25 = vector.broadcast %cst_19 : f32 to vector<16x512xf32>
    %26 = arith.addf %25, %24 : vector<16x512xf32>
    %27 = arith.divf %25, %26 : vector<16x512xf32>
    %28 = arith.truncf %27 : vector<16x512xf32> to vector<16x512xbf16>
    %c0_20 = arith.constant 0 : index
    %c0_21 = arith.constant 0 : index
    %29 = vector.load %arg9[%c0_20, %c0_21] : memref<16x512xbf16, #tpu.memory_space<vmem>>, vector<16x512xbf16>
    tpu.vector_store %arg9[%c0_20, %c0_21], %28 {strides = array<i32>} : memref<16x512xbf16, #tpu.memory_space<vmem>>, vector<16x512xbf16>,
    return
  }
  func.func @transform_0(%arg0: i32) -> (i32, i32) {
    %c0_i32 = arith.constant 0 : i32
    %c0_i32_0 = arith.constant 0 : i32
    return %arg0, %c0_i32 : i32, i32
  }
  func.func @transform_1(%arg0: i32) -> (i32, i32) {
    %c0_i32 = arith.constant 0 : i32
    %c0_i32_0 = arith.constant 0 : i32
    return %arg0, %c0_i32 : i32, i32
  }
  func.func @transform_2(%arg0: i32) -> (i32, i32) {
    %c0_i32 = arith.constant 0 : i32
    %c0_i32_0 = arith.constant 0 : i32
    %c0_i32_1 = arith.constant 0 : i32
    return %c0_i32, %c0_i32_0 : i32, i32
  }
  func.func @transform_3(%arg0: i32) -> (i32, i32) {
    %c0_i32 = arith.constant 0 : i32
    %c0_i32_0 = arith.constant 0 : i32
    %c0_i32_1 = arith.constant 0 : i32
    return %c0_i32, %c0_i32_0 : i32, i32
  }
  func.func @transform_4(%arg0: i32) -> (i32, i32) {
    %c0_i32 = arith.constant 0 : i32
    %c0_i32_0 = arith.constant 0 : i32
    %c0_i32_1 = arith.constant 0 : i32
    return %c0_i32, %c0_i32_0 : i32, i32
  }
  func.func @transform_5(%arg0: i32) -> (i32, i32) {
    %c0_i32 = arith.constant 0 : i32
    %c0_i32_0 = arith.constant 0 : i32
    %c0_i32_1 = arith.constant 0 : i32
    return %c0_i32, %c0_i32_0 : i32, i32
  }
  func.func @transform_6(%arg0: i32) -> (i32, i32) {
    %c0_i32 = arith.constant 0 : i32
    %c0_i32_0 = arith.constant 0 : i32
    %c0_i32_1 = arith.constant 0 : i32
    return %c0_i32, %c0_i32_0 : i32, i32
  }
  func.func @transform_7(%arg0: i32) -> (i32, i32) {
    %c0_i32 = arith.constant 0 : i32
    %c0_i32_0 = arith.constant 0 : i32
    %c0_i32_1 = arith.constant 0 : i32
    return %c0_i32, %c0_i32_0 : i32, i32
  }
  func.func @transform_8(%arg0: i32) -> (i32, i32) {
    %c0_i32 = arith.constant 0 : i32
    %c0_i32_0 = arith.constant 0 : i32
    return %arg0, %c0_i32 : i32, i32
  }
}

</mosaic_0001>

<bundles_post_ra>
// kernel: _hadamard_product_impl.1
= control target key start
LH: loop header
LB: loop body
LE: loop exit
PB: predicated region body
PF: predicated region fallthrough
CT: control target
= control target key end

     0   :  { %13 = vsyncpa [#allocation3], 0  ;;  %s4575_s0 = inlined_call_operand.hbm [shape: bf16[16,512], index: 0, kind: input, shape index: {}]   ;;  %s4576_s1 = inlined_call_operand.hbm [shape: bf16[16,512], index: 1, kind: input, shape index: {}]   ;;  %s4577_s2 = inlined_call_operand.hbm [shape: bf16[512,512], index: 2, kind: input, shape index: {}]   ;;  %s4578_s3 = inlined_call_operand.vmem [shape: f32[1,512], index: 3, kind: input, shape index: {}]   ;;  %s4579_s4 = inlined_call_operand.hbm [shape: bf16[512,512], index: 4, kind: input, shape index: {}]   ;;  %s4580_s5 = inlined_call_operand.vmem [shape: f32[1,512], index: 5, kind: input, shape index: {}]   ;;  %s4581_s6 = inlined_call_operand.hbm [shape: bf16[512,512], index: 6, kind: input, shape index: {}]   ;;  %s4582_s7 = inlined_call_operand.vmem [shape: f32[1,512], index: 7, kind: input, shape index: {}]   ;;  %s4583_s8 = inlined_call_operand.hbm [shape: bf16[16,512], index: 8, kind: output, shape index: {}]  }
   0x1   :  { %14 = vsyncpa [#allocation6], 0 }
   0x2   :  { %15 = vsyncpa [#allocation9], 0 }
   0x3   :  { %16 = vsyncpa [#allocation4], 0  ;;  %s4379_s27 = smov [#allocation5]   ;;  %s4380_s29 = smov [#allocation8]  }
   0x4   :  { %s34_s28 = sshll.u32 %s4379_s27, 4  ;;  %s60_s30 = sshll.u32 %s4380_s29, 4  ;;  %s35_s28 = int_to_ptr.vmem [resolvable:$true] %s34_s28  ;;  %s4432_s30 = int_to_ptr.vmem [resolvable:$true] %s60_s30 }
   0x5   :  { %s4239_s11 = scalar_lea.hbm %s4576_s1, 512 }
   0x6   :  { %p4240_p0 = scmp.ne.s32.totalorder %s4576_s1, %s4239_s11  ;;  %p4243_p1 = scmp.lt.u32.totalorder %s4239_s11, %s4576_s1 }
   0x8   :  { %p4245_p2 = pnand %p4243_p1, %p4240_p0 }
   0xa   :  { %4248 = shalt.err (!%p4245_p2)
}
   0xb   :  { %s4249_s16 = scalar_lea.vmem %s35_s28, 512  ;;  %p4254_p4 = scmp.lt.s32.totalorder %s35_s28, %s35_s28 }
   0xc   :  { %p4250_p3 = scmp.ne.s32.totalorder %s35_s28, %s4249_s16  ;;  %p4255_p5 = scmp.lt.s32.totalorder %s4249_s16, %s4249_s16 }
   0xe   :  { %p4256_p6 = por %p4255_p5, %p4254_p4 }
  0x10   :  { %p4257_p7 = pnand %p4256_p6, %p4250_p3 }
  0x12   :  { %4260 = shalt.err (!%p4257_p7)
}
  0x13   :  { %s4381_s17 = smov 256   ;;  %s4382_s18 = smov 16  }
  0x14   :  { %40 = dma.hbm_to_vmem [thread:$0]  %s4576_s1, 512, %s35_s28, [#allocation6], %s4381_s17, %s4381_s17, %s4382_s18  }
  0x15   :  { %s4261_s23 = scalar_lea.hbm %s4579_s4, 16384 }
  0x16   :  { %p4262_p8 = scmp.ne.s32.totalorder %s4579_s4, %s4261_s23  ;;  %p4265_p9 = scmp.lt.u32.totalorder %s4261_s23, %s4579_s4 }
  0x18   :  { %p4267_p10 = pnand %p4265_p9, %p4262_p8 }
  0x1a   :  { %4270 = shalt.err (!%p4267_p10)
}
  0x1b   :  { %s4271_s29 = scalar_lea.vmem %s4432_s30, 16384  ;;  %p4276_p12 = scmp.lt.s32.totalorder %s4432_s30, %s4432_s30 }
  0x1c   :  { %p4272_p11 = scmp.ne.s32.totalorder %s4432_s30, %s4271_s29  ;;  %p4277_p13 = scmp.lt.s32.totalorder %s4271_s29, %s4271_s29 }
  0x1e   :  { %p4278_p0 = por %p4277_p13, %p4276_p12 }
  0x20   :  { %p4279_p1 = pnand %p4278_p0, %p4272_p11 }
  0x22   :  { %4282 = shalt.err (!%p4279_p1)
}
  0x23   :  { %66 = dma.hbm_to_vmem [thread:$0]  %s4579_s4, 16384, %s4432_s30, [#allocation9], %s4381_s17, %s4381_s17, %s4382_s18  }
  0x24   :  { %s4383_s9 = smov [#allocation2]   ;;  %s4384_s11 = smov [#allocation7]  }
  0x25   :  { %s22_s10 = sshll.u32 %s4383_s9, 4  ;;  %s46_s12 = sshll.u32 %s4384_s11, 4  ;;  %s23_s10 = int_to_ptr.vmem [resolvable:$true] %s22_s10  ;;  %s4469_s12 = int_to_ptr.vmem [resolvable:$true] %s46_s12 }
  0x26   :  { %s4283_s15 = scalar_lea.hbm %s4575_s0, 512 }
  0x27   :  { %p4284_p2 = scmp.ne.s32.totalorder %s4575_s0, %s4283_s15  ;;  %p4287_p3 = scmp.lt.u32.totalorder %s4283_s15, %s4575_s0 }
  0x29   :  { %p4289_p4 = pnand %p4287_p3, %p4284_p2 }
  0x2b   :  { %4292 = shalt.err (!%p4289_p4)
}
  0x2c   :  { %s4293_s4 = scalar_lea.vmem %s23_s10, 512  ;;  %p4298_p6 = scmp.lt.s32.totalorder %s23_s10, %s23_s10 }
  0x2d   :  { %p4294_p5 = scmp.ne.s32.totalorder %s23_s10, %s4293_s4  ;;  %p4299_p7 = scmp.lt.s32.totalorder %s4293_s4, %s4293_s4 }
  0x2f   :  { %p4300_p8 = por %p4299_p7, %p4298_p6 }
  0x31   :  { %p4301_p9 = pnand %p4300_p8, %p4294_p5 }
  0x33   :  { %4304 = shalt.err (!%p4301_p9)
}
  0x34   :  { %28 = dma.hbm_to_vmem [thread:$0]  %s4575_s0, 512, %s23_s10, [#allocation3], %s4381_s17, %s4381_s17, %s4382_s18  }
  0x35   :  { %s4305_s25 = scalar_lea.hbm %s4577_s2, 16384 }
  0x36   :  { %p4306_p10 = scmp.ne.s32.totalorder %s4577_s2, %s4305_s25  ;;  %p4309_p11 = scmp.lt.u32.totalorder %s4305_s25, %s4577_s2 }
  0x38   :  { %p4311_p12 = pnand %p4309_p11, %p4306_p10 }
  0x3a   :  { %4314 = shalt.err (!%p4311_p12)
}
  0x3b   :  { %s4315_s28 = scalar_lea.vmem %s4469_s12, 16384  ;;  %p4320_p0 = scmp.lt.s32.totalorder %s4469_s12, %s4469_s12 }
  0x3c   :  { %p4316_p13 = scmp.ne.s32.totalorder %s4469_s12, %s4315_s28  ;;  %p4321_p1 = scmp.lt.s32.totalorder %s4315_s28, %s4315_s28 }
  0x3e   :  { %p4322_p2 = por %p4321_p1, %p4320_p0 }
  0x40   :  { %p4323_p3 = pnand %p4322_p2, %p4316_p13 }
  0x42   :  { %4326 = shalt.err (!%p4323_p3)
}
  0x43   :  { %52 = dma.hbm_to_vmem [thread:$0]  %s4577_s2, 16384, %s4469_s12, [#allocation6], %s4381_s17, %s4381_s17, %s4382_s18  }
  0x44   :  { %s4385_s10 = smov [#allocation10]   ;;  %s4327_s15 = scalar_lea.hbm %s4581_s6, 16384 }
  0x45   :  { %s74_s11 = sshll.u32 %s4385_s10, 4  ;;  %p4328_p4 = scmp.ne.s32.totalorder %s4581_s6, %s4327_s15  ;;  %s75_s11 = int_to_ptr.vmem [resolvable:$true] %s74_s11 }
  0x46   :  { %p4331_p5 = scmp.lt.u32.totalorder %s4327_s15, %s4581_s6 }
  0x48   :  { %p4333_p6 = pnand %p4331_p5, %p4328_p4 }
  0x4a   :  { %4336 = shalt.err (!%p4333_p6)
}
  0x4b   :  { %s4337_s4 = scalar_lea.vmem %s75_s11, 16384  ;;  %p4342_p8 = scmp.lt.s32.totalorder %s75_s11, %s75_s11 }
  0x4c   :  { %p4338_p7 = scmp.ne.s32.totalorder %s75_s11, %s4337_s4  ;;  %p4343_p9 = scmp.lt.s32.totalorder %s4337_s4, %s4337_s4 }
  0x4e   :  { %p4344_p10 = por %p4343_p9, %p4342_p8 }
  0x50   :  { %p4345_p11 = pnand %p4344_p10, %p4338_p7 }
  0x52   :  { %4348 = shalt.err (!%p4345_p11)
}
  0x53   :  { %80 = dma.hbm_to_vmem [thread:$0]  %s4581_s6, 16384, %s75_s11, [#allocation9], %s4381_s17, %s4381_s17, %s4382_s18  }
  0x54   :  { %4371 = dma.done.wait [#allocation3], 512  }
  0x55   :  { %4372 = vsyncadd [#allocation3], 4294966784 }
  0x56   :  { %4373 = dma.done.wait [#allocation6], 16896  }
  0x57   :  { %4374 = vsyncadd [#allocation6], 4294950400 }
  0x58   :  { %4375 = dma.done.wait [#allocation9], 32768  }
  0x59   :  { %4376 = vsyncadd [#allocation9], 4294934528  ;;  %v3619_v0 = vld [vmem:[#allocation7 + $0x4] ss:$16 sps:$4 sm:$0xff]   ;;  %v3621_v1 = vld [vmem:[#allocation7 + $0xc] ss:$16 sps:$4 sm:$0xff]  }
  0x5a   :  { %912 = vmatprep.subr.bf16.mxu0 %v3619_v0  ;;  %v3623_v2 = vld [vmem:[#allocation7] ss:$16 sps:$4 sm:$0xff]   ;;  %v3624_v3 = vld [vmem:[#allocation7 + $0x8] ss:$16 sps:$4 sm:$0xff]   ;;  %998 = vmatprep.subr.bf16.mxu1 %v3621_v1  ;;  %v3625_v4 = vld [vmem:[#allocation7 + $0x24] ss:$16 sps:$4 sm:$0xff]  }
  0x5b   :  { %913 = vmatpush1.bf16.msra.mxu0 %v3623_v2  ;;  %999 = vmatpush1.bf16.msra.mxu1 %v3624_v3  ;;  %v3627_v5 = vld [vmem:[#allocation7 + $0x2c] ss:$16 sps:$4 sm:$0xff]   ;;  %v3629_v6 = vld [vmem:[#allocation7 + $0x20] ss:$16 sps:$4 sm:$0xff]   ;;  %v3630_v7 = vld [vmem:[#allocation7 + $0x28] ss:$16 sps:$4 sm:$0xff]  }
  0x5c   :  { %914 = vmatprep.subr.bf16.mxu0 %v3625_v4  ;;  %1000 = vmatprep.subr.bf16.mxu1 %v3627_v5  ;;  %v3631_v8 = vld [vmem:[#allocation7 + $0x44] ss:$16 sps:$4 sm:$0xff]   ;;  %v3633_v9 = vld [vmem:[#allocation7 + $0x4c] ss:$16 sps:$4 sm:$0xff]   ;;  %v3635_v10 = vld [vmem:[#allocation7 + $0x40] ss:$16 sps:$4 sm:$0xff]  }
  0x5d   :  { %v3636_v11 = vld [vmem:[#allocation7 + $0x48] ss:$16 sps:$4 sm:$0xff]   ;;  %v3637_v12 = vld [vmem:[#allocation7 + $0x64] ss:$16 sps:$4 sm:$0xff]   ;;  %v3639_v13 = vld [vmem:[#allocation7 + $0x6c] ss:$16 sps:$4 sm:$0xff]  }
  0x5e   :  { %v3641_v14 = vld [vmem:[#allocation7 + $0x60] ss:$16 sps:$4 sm:$0xff]   ;;  %v3642_v15 = vld [vmem:[#allocation7 + $0x68] ss:$16 sps:$4 sm:$0xff]   ;;  %v3643_v16 = vld [vmem:[#allocation7 + $0x84] ss:$16 sps:$4 sm:$0xff]  }
  0x5f   :  { %915 = vmatpush1.bf16.msra.mxu0 %v3629_v6  ;;  %1001 = vmatpush1.bf16.msra.mxu1 %v3630_v7  ;;  %v3645_v17 = vld [vmem:[#allocation7 + $0x8c] ss:$16 sps:$4 sm:$0xff]   ;;  %v3647_v18 = vld [vmem:[#allocation7 + $0x80] ss:$16 sps:$4 sm:$0xff]   ;;  %v3648_v19 = vld [vmem:[#allocation7 + $0x88] ss:$16 sps:$4 sm:$0xff]  }
  0x60   :  { %916 = vmatprep.subr.bf16.mxu0 %v3631_v8  ;;  %1002 = vmatprep.subr.bf16.mxu1 %v3633_v9  ;;  %v3649_v20 = vld [vmem:[#allocation7 + $0xa4] ss:$16 sps:$4 sm:$0xff]   ;;  %v3651_v21 = vld [vmem:[#allocation7 + $0xac] ss:$16 sps:$4 sm:$0xff]   ;;  %v3653_v22 = vld [vmem:[#allocation7 + $0xa0] ss:$16 sps:$4 sm:$0xff]  }
  0x61   :  { %v3654_v23 = vld [vmem:[#allocation7 + $0xa8] ss:$16 sps:$4 sm:$0xff]   ;;  %v3655_v24 = vld [vmem:[#allocation7 + $0xc4] ss:$16 sps:$4 sm:$0xff]   ;;  %v3657_v25 = vld [vmem:[#allocation7 + $0xcc] ss:$16 sps:$4 sm:$0xff]  }
  0x62   :  { %v3659_v26 = vld [vmem:[#allocation7 + $0xc0] ss:$16 sps:$4 sm:$0xff]   ;;  %v3660_v27 = vld [vmem:[#allocation7 + $0xc8] ss:$16 sps:$4 sm:$0xff]   ;;  %v3661_v28 = vld [vmem:[#allocation7 + $0xe4] ss:$16 sps:$4 sm:$0xff]  }
  0x63   :  { %917 = vmatpush1.bf16.msra.mxu0 %v3635_v10  ;;  %1003 = vmatpush1.bf16.msra.mxu1 %v3636_v11  ;;  %v3663_v29 = vld [vmem:[#allocation7 + $0xec] ss:$16 sps:$4 sm:$0xff]   ;;  %v3665_v30 = vld [vmem:[#allocation7 + $0xe0] ss:$16 sps:$4 sm:$0xff]   ;;  %v3666_v31 = vld [vmem:[#allocation7 + $0xe8] ss:$16 sps:$4 sm:$0xff]  }
  0x64   :  { %918 = vmatprep.subr.bf16.mxu0 %v3637_v12  ;;  %1004 = vmatprep.subr.bf16.mxu1 %v3639_v13  ;;  %v3667_v32 = vld [vmem:[#allocation7 + $0x104] ss:$16 sps:$4 sm:$0xff]   ;;  %v3669_v33 = vld [vmem:[#allocation7 + $0x10c] ss:$16 sps:$4 sm:$0xff]   ;;  %v3671_v34 = vld [vmem:[#allocation7 + $0x100] ss:$16 sps:$4 sm:$0xff]  }
  0x65   :  { %v3672_v35 = vld [vmem:[#allocation7 + $0x108] ss:$16 sps:$4 sm:$0xff]   ;;  %v3673_v36 = vld [vmem:[#allocation7 + $0x124] ss:$16 sps:$4 sm:$0xff]   ;;  %v3675_v37 = vld [vmem:[#allocation7 + $0x12c] ss:$16 sps:$4 sm:$0xff]  }
  0x66   :  { %v3677_v38 = vld [vmem:[#allocation7 + $0x120] ss:$16 sps:$4 sm:$0xff]   ;;  %v3678_v39 = vld [vmem:[#allocation7 + $0x128] ss:$16 sps:$4 sm:$0xff]   ;;  %v3679_v40 = vld [vmem:[#allocation7 + $0x144] ss:$16 sps:$4 sm:$0xff]  }
  0x67   :  { %919 = vmatpush1.bf16.msra.mxu0 %v3641_v14  ;;  %1005 = vmatpush1.bf16.msra.mxu1 %v3642_v15  ;;  %v3681_v41 = vld [vmem:[#allocation7 + $0x14c] ss:$16 sps:$4 sm:$0xff]   ;;  %v3683_v42 = vld [vmem:[#allocation7 + $0x140] ss:$16 sps:$4 sm:$0xff]   ;;  %v3684_v43 = vld [vmem:[#allocation7 + $0x148] ss:$16 sps:$4 sm:$0xff]  }
  0x68   :  { %920 = vmatprep.subr.bf16.mxu0 %v3643_v16  ;;  %1006 = vmatprep.subr.bf16.mxu1 %v3645_v17  ;;  %v3685_v44 = vld [vmem:[#allocation7 + $0x164] ss:$16 sps:$4 sm:$0xff]   ;;  %v3687_v45 = vld [vmem:[#allocation7 + $0x16c] ss:$16 sps:$4 sm:$0xff]   ;;  %v3689_v46 = vld [vmem:[#allocation7 + $0x160] ss:$16 sps:$4 sm:$0xff]  }
  0x69   :  { %v3690_v47 = vld [vmem:[#allocation7 + $0x168] ss:$16 sps:$4 sm:$0xff]   ;;  %v3717_v48 = vld [vmem:[#allocation2 + $0x4] ss:$16 sps:$4 sm:$0xff]   ;;  %v3693_v50 = vld [vmem:[#allocation7 + $0x18c] ss:$16 sps:$4 sm:$0xff]  }
  0x6a   :  { %v3691_v49 = vld [vmem:[#allocation7 + $0x184] ss:$16 sps:$4 sm:$0xff]   ;;  %944 = vmatprep.mubr.bf16.mxu0 %v3717_v48  ;;  %1030 = vmatprep.mubr.bf16.mxu1 %v3717_v48  ;;  %v3695_v51 = vld [vmem:[#allocation7 + $0x180] ss:$16 sps:$4 sm:$0xff]   ;;  %v3696_v52 = vld [vmem:[#allocation7 + $0x188] ss:$16 sps:$4 sm:$0xff]  }
  0x6b   :  { %921 = vmatpush1.bf16.msra.mxu0 %v3647_v18  ;;  %1007 = vmatpush1.bf16.msra.mxu1 %v3648_v19  ;;  %v3697_v53 = vld [vmem:[#allocation7 + $0x1a4] ss:$16 sps:$4 sm:$0xff]   ;;  %v3699_v54 = vld [vmem:[#allocation7 + $0x1ac] ss:$16 sps:$4 sm:$0xff]   ;;  %v3701_v55 = vld [vmem:[#allocation7 + $0x1a0] ss:$16 sps:$4 sm:$0xff]  }
  0x6c   :  { %922 = vmatprep.subr.bf16.mxu0 %v3649_v20  ;;  %1008 = vmatprep.subr.bf16.mxu1 %v3651_v21  ;;  %v3702_v56 = vld [vmem:[#allocation7 + $0x1a8] ss:$16 sps:$4 sm:$0xff]   ;;  %v3703_v57 = vld [vmem:[#allocation7 + $0x1c4] ss:$16 sps:$4 sm:$0xff]   ;;  %v3705_v58 = vld [vmem:[#allocation7 + $0x1cc] ss:$16 sps:$4 sm:$0xff]  }
  0x6d   :  { %v3707_v59 = vld [vmem:[#allocation7 + $0x1c0] ss:$16 sps:$4 sm:$0xff]   ;;  %v3708_v60 = vld [vmem:[#allocation7 + $0x1c8] ss:$16 sps:$4 sm:$0xff]   ;;  %v3709_v61 = vld [vmem:[#allocation7 + $0x1e4] ss:$16 sps:$4 sm:$0xff]  }
  0x6e   :  { %v3711_v62 = vld [vmem:[#allocation7 + $0x1ec] ss:$16 sps:$4 sm:$0xff]   ;;  %v3713_v63 = vld [vmem:[#allocation7 + $0x1e0] ss:$16 sps:$4 sm:$0xff]   ;;  %v3714_v0 = vld [vmem:[#allocation7 + $0x1e8] ss:$16 sps:$4 sm:$0xff]  }
  0x6f   :  { %923 = vmatpush1.bf16.msra.mxu0 %v3653_v22  ;;  %1009 = vmatpush1.bf16.msra.mxu1 %v3654_v23  ;;  %v3720_v1 = vld [vmem:[#allocation7 + $0x204] ss:$16 sps:$4 sm:$0xff]   ;;  %v3723_v2 = vld [vmem:[#allocation7 + $0x20c] ss:$16 sps:$4 sm:$0xff]   ;;  %v3715_v3 = vld [vmem:[#allocation2] ss:$16 sps:$4 sm:$0xff]  }
  0x70   :  { %924 = vmatprep.subr.bf16.mxu0 %v3655_v24  ;;  %1010 = vmatprep.subr.bf16.mxu1 %v3657_v25  ;;  %v3718_v4 = vld [vmem:[#allocation7 + $0x200] ss:$16 sps:$4 sm:$0xff]   ;;  %v3721_v5 = vld [vmem:[#allocation7 + $0x208] ss:$16 sps:$4 sm:$0xff]   ;;  %v3726_v6 = vld [vmem:[#allocation7 + $0x224] ss:$16 sps:$4 sm:$0xff]  }
  0x71   :  { %v3729_v7 = vld [vmem:[#allocation7 + $0x22c] ss:$16 sps:$4 sm:$0xff]   ;;  %v3724_v8 = vld [vmem:[#allocation7 + $0x220] ss:$16 sps:$4 sm:$0xff]   ;;  %v3727_v9 = vld [vmem:[#allocation7 + $0x228] ss:$16 sps:$4 sm:$0xff]  }
  0x72   :  { %v3732_v10 = vld [vmem:[#allocation7 + $0x244] ss:$16 sps:$4 sm:$0xff]   ;;  %v3735_v11 = vld [vmem:[#allocation7 + $0x24c] ss:$16 sps:$4 sm:$0xff]   ;;  %v3730_v12 = vld [vmem:[#allocation7 + $0x240] ss:$16 sps:$4 sm:$0xff]  }
  0x73   :  { %925 = vmatpush1.bf16.msra.mxu0 %v3659_v26  ;;  %1011 = vmatpush1.bf16.msra.mxu1 %v3660_v27  ;;  %v3733_v13 = vld [vmem:[#allocation7 + $0x248] ss:$16 sps:$4 sm:$0xff]   ;;  %v3738_v14 = vld [vmem:[#allocation7 + $0x264] ss:$16 sps:$4 sm:$0xff]   ;;  %v3741_v15 = vld [vmem:[#allocation7 + $0x26c] ss:$16 sps:$4 sm:$0xff]  }
  0x74   :  { %926 = vmatprep.subr.bf16.mxu0 %v3661_v28  ;;  %1012 = vmatprep.subr.bf16.mxu1 %v3663_v29  ;;  %v3736_v16 = vld [vmem:[#allocation7 + $0x260] ss:$16 sps:$4 sm:$0xff]   ;;  %v3739_v17 = vld [vmem:[#allocation7 + $0x268] ss:$16 sps:$4 sm:$0xff]   ;;  %v3744_v18 = vld [vmem:[#allocation7 + $0x284] ss:$16 sps:$4 sm:$0xff]  }
  0x75   :  { %v3747_v19 = vld [vmem:[#allocation7 + $0x28c] ss:$16 sps:$4 sm:$0xff]   ;;  %v3742_v20 = vld [vmem:[#allocation7 + $0x280] ss:$16 sps:$4 sm:$0xff]   ;;  %v3745_v21 = vld [vmem:[#allocation7 + $0x288] ss:$16 sps:$4 sm:$0xff]  }
  0x76   :  { %v3750_v22 = vld [vmem:[#allocation7 + $0x2a4] ss:$16 sps:$4 sm:$0xff]   ;;  %v3753_v23 = vld [vmem:[#allocation7 + $0x2ac] ss:$16 sps:$4 sm:$0xff]   ;;  %v3748_v24 = vld [vmem:[#allocation7 + $0x2a0] ss:$16 sps:$4 sm:$0xff]  }
  0x77   :  { %927 = vmatpush1.bf16.msra.mxu0 %v3665_v30  ;;  %1013 = vmatpush1.bf16.msra.mxu1 %v3666_v31  ;;  %v3751_v25 = vld [vmem:[#allocation7 + $0x2a8] ss:$16 sps:$4 sm:$0xff]   ;;  %v3756_v26 = vld [vmem:[#allocation7 + $0x2c4] ss:$16 sps:$4 sm:$0xff]   ;;  %v3759_v27 = vld [vmem:[#allocation7 + $0x2cc] ss:$16 sps:$4 sm:$0xff]  }
  0x78   :  { %928 = vmatprep.subr.bf16.mxu0 %v3667_v32  ;;  %1014 = vmatprep.subr.bf16.mxu1 %v3669_v33  ;;  %v3754_v28 = vld [vmem:[#allocation7 + $0x2c0] ss:$16 sps:$4 sm:$0xff]   ;;  %v3757_v29 = vld [vmem:[#allocation7 + $0x2c8] ss:$16 sps:$4 sm:$0xff]   ;;  %v3816_v30 = vld [vmem:[#allocation2 + $0xc] ss:$16 sps:$4 sm:$0xff]  }
  0x79   :  { %v3762_v31 = vld [vmem:[#allocation7 + $0x2e4] ss:$16 sps:$4 sm:$0xff]   ;;  %v3765_v32 = vld [vmem:[#allocation7 + $0x2ec] ss:$16 sps:$4 sm:$0xff]   ;;  %v3760_v33 = vld [vmem:[#allocation7 + $0x2e0] ss:$16 sps:$4 sm:$0xff]  }
  0x7a   :  { %v3789_v48 = vld [vmem:[#allocation7 + $0x36c] ss:$16 sps:$4 sm:$0xff]  }
  0x7b   :  { %929 = vmatpush1.bf16.msra.mxu0 %v3671_v34  ;;  %1015 = vmatpush1.bf16.msra.mxu1 %v3672_v35  ;;  %v3763_v34 = vld [vmem:[#allocation7 + $0x2e8] ss:$16 sps:$4 sm:$0xff]   ;;  %v3768_v35 = vld [vmem:[#allocation7 + $0x304] ss:$16 sps:$4 sm:$0xff]  }
  0x7c   :  { %930 = vmatprep.subr.bf16.mxu0 %v3673_v36  ;;  %1016 = vmatprep.subr.bf16.mxu1 %v3675_v37  ;;  %v3771_v36 = vld [vmem:[#allocation7 + $0x30c] ss:$16 sps:$4 sm:$0xff]   ;;  %v3766_v37 = vld [vmem:[#allocation7 + $0x300] ss:$16 sps:$4 sm:$0xff]  }
  0x7f   :  { %931 = vmatpush1.bf16.msra.mxu0 %v3677_v38  ;;  %1017 = vmatpush1.bf16.msra.mxu1 %v3678_v39  ;;  %v3769_v38 = vld [vmem:[#allocation7 + $0x308] ss:$16 sps:$4 sm:$0xff]   ;;  %v3774_v39 = vld [vmem:[#allocation7 + $0x324] ss:$16 sps:$4 sm:$0xff]  }
  0x80   :  { %932 = vmatprep.subr.bf16.mxu0 %v3679_v40  ;;  %1018 = vmatprep.subr.bf16.mxu1 %v3681_v41  ;;  %v3777_v40 = vld [vmem:[#allocation7 + $0x32c] ss:$16 sps:$4 sm:$0xff]   ;;  %v3772_v41 = vld [vmem:[#allocation7 + $0x320] ss:$16 sps:$4 sm:$0xff]  }
  0x83   :  { %933 = vmatpush1.bf16.msra.mxu0 %v3683_v42  ;;  %1019 = vmatpush1.bf16.msra.mxu1 %v3684_v43  ;;  %v3775_v42 = vld [vmem:[#allocation7 + $0x328] ss:$16 sps:$4 sm:$0xff]   ;;  %v3780_v43 = vld [vmem:[#allocation7 + $0x344] ss:$16 sps:$4 sm:$0xff]  }
  0x84   :  { %934 = vmatprep.subr.bf16.mxu0 %v3685_v44  ;;  %1020 = vmatprep.subr.bf16.mxu1 %v3687_v45  ;;  %v3783_v44 = vld [vmem:[#allocation7 + $0x34c] ss:$16 sps:$4 sm:$0xff]   ;;  %v3778_v45 = vld [vmem:[#allocation7 + $0x340] ss:$16 sps:$4 sm:$0xff]  }
  0x87   :  { %935 = vmatpush1.bf16.msra.mxu0 %v3689_v46  ;;  %1021 = vmatpush1.bf16.msra.mxu1 %v3690_v47  ;;  %v3781_v46 = vld [vmem:[#allocation7 + $0x348] ss:$16 sps:$4 sm:$0xff]   ;;  %v3786_v47 = vld [vmem:[#allocation7 + $0x364] ss:$16 sps:$4 sm:$0xff]  }
  0x88   :  { %936 = vmatprep.subr.bf16.mxu0 %v3691_v49  ;;  %1022 = vmatprep.subr.bf16.mxu1 %v3693_v50  ;;  %v3784_v49 = vld [vmem:[#allocation7 + $0x360] ss:$16 sps:$4 sm:$0xff]   ;;  %v3787_v50 = vld [vmem:[#allocation7 + $0x368] ss:$16 sps:$4 sm:$0xff]  }
  0x8b   :  { %937 = vmatpush1.bf16.msra.mxu0 %v3695_v51  ;;  %1023 = vmatpush1.bf16.msra.mxu1 %v3696_v52  ;;  %v3792_v51 = vld [vmem:[#allocation7 + $0x384] ss:$16 sps:$4 sm:$0xff]   ;;  %v3795_v52 = vld [vmem:[#allocation7 + $0x38c] ss:$16 sps:$4 sm:$0xff]  }
  0x8c   :  { %938 = vmatprep.subr.bf16.mxu0 %v3697_v53  ;;  %1024 = vmatprep.subr.bf16.mxu1 %v3699_v54  ;;  %v3790_v53 = vld [vmem:[#allocation7 + $0x380] ss:$16 sps:$4 sm:$0xff]   ;;  %v3793_v54 = vld [vmem:[#allocation7 + $0x388] ss:$16 sps:$4 sm:$0xff]  }
  0x8f   :  { %939 = vmatpush1.bf16.msra.mxu0 %v3701_v55  ;;  %1025 = vmatpush1.bf16.msra.mxu1 %v3702_v56  ;;  %v3798_v55 = vld [vmem:[#allocation7 + $0x3a4] ss:$16 sps:$4 sm:$0xff]   ;;  %v3801_v56 = vld [vmem:[#allocation7 + $0x3ac] ss:$16 sps:$4 sm:$0xff]  }
  0x90   :  { %940 = vmatprep.subr.bf16.mxu0 %v3703_v57  ;;  %1026 = vmatprep.subr.bf16.mxu1 %v3705_v58  ;;  %v3796_v57 = vld [vmem:[#allocation7 + $0x3a0] ss:$16 sps:$4 sm:$0xff]   ;;  %v3799_v58 = vld [vmem:[#allocation7 + $0x3a8] ss:$16 sps:$4 sm:$0xff]  }
  0x93   :  { %941 = vmatpush1.bf16.msra.mxu0 %v3707_v59  ;;  %1027 = vmatpush1.bf16.msra.mxu1 %v3708_v60  ;;  %v3804_v59 = vld [vmem:[#allocation7 + $0x3c4] ss:$16 sps:$4 sm:$0xff]   ;;  %v3807_v60 = vld [vmem:[#allocation7 + $0x3cc] ss:$16 sps:$4 sm:$0xff]  }
  0x94   :  { %942 = vmatprep.subr.bf16.mxu0 %v3709_v61  ;;  %1028 = vmatprep.subr.bf16.mxu1 %v3711_v62  ;;  %v3802_v61 = vld [vmem:[#allocation7 + $0x3c0] ss:$16 sps:$4 sm:$0xff]   ;;  %v3805_v62 = vld [vmem:[#allocation7 + $0x3c8] ss:$16 sps:$4 sm:$0xff]  }
  0x97   :  { %943 = vmatpush1.bf16.msra.mxu0 %v3713_v63  ;;  %1029 = vmatpush1.bf16.msra.mxu1 %v3714_v0  ;;  %v3810_v63 = vld [vmem:[#allocation7 + $0x3e4] ss:$16 sps:$4 sm:$0xff]   ;;  %v3813_v0 = vld [vmem:[#allocation7 + $0x3ec] ss:$16 sps:$4 sm:$0xff]  }
  0x98   :  { %955 = vmatprep.subr.bf16.mxu0 %v3720_v1  ;;  %1041 = vmatprep.subr.bf16.mxu1 %v3723_v2  ;;  %v3808_v1 = vld [vmem:[#allocation7 + $0x3e0] ss:$16 sps:$4 sm:$0xff]   ;;  %v3811_v2 = vld [vmem:[#allocation7 + $0x3e8] ss:$16 sps:$4 sm:$0xff]  }
  0x9a   :  { %945 = vmatmul.mubr.bf16.vlgmr.msra.gmra.mrb[0].mxu0 %v3715_v3  ;;  %1031 = vmatmul.mubr.bf16.vlgmr.msra.gmra.mrb[0].mxu1 %v3715_v3  ;;  %v3819_v3 = vld [vmem:[#allocation8 + $0x4] ss:$16 sps:$4 sm:$0xff]  }
  0x9b   :  { %956 = vmatpush1.bf16.msra.mxu0 %v3718_v4  ;;  %1042 = vmatpush1.bf16.msra.mxu1 %v3721_v5  ;;  %v3822_v4 = vld [vmem:[#allocation8 + $0xc] ss:$16 sps:$4 sm:$0xff]   ;;  %v3814_v5 = vld [vmem:[#allocation2 + $0x8] ss:$16 sps:$4 sm:$0xff]  }
  0x9c   :  { %957 = vmatprep.subr.bf16.mxu0 %v3726_v6  ;;  %1043 = vmatprep.subr.bf16.mxu1 %v3729_v7  ;;  %v3817_v6 = vld [vmem:[#allocation8] ss:$16 sps:$4 sm:$0xff]   ;;  %v3820_v7 = vld [vmem:[#allocation8 + $0x8] ss:$16 sps:$4 sm:$0xff]  }
  0x9d   :  { %987 = vmatprep.mubr.bf16.mxu0 %v3816_v30  ;;  %1073 = vmatprep.mubr.bf16.mxu1 %v3816_v30  ;;  %v3858_v30 = vld [vmem:[#allocation8 + $0xcc] ss:$16 sps:$4 sm:$0xff]  }
  0x9f   :  { %958 = vmatpush1.bf16.msra.mxu0 %v3724_v8  ;;  %1044 = vmatpush1.bf16.msra.mxu1 %v3727_v9  ;;  %v3825_v8 = vld [vmem:[#allocation8 + $0x24] ss:$16 sps:$4 sm:$0xff]   ;;  %v3828_v9 = vld [vmem:[#allocation8 + $0x2c] ss:$16 sps:$4 sm:$0xff]  }
  0xa0   :  { %959 = vmatprep.subr.bf16.mxu0 %v3732_v10  ;;  %1045 = vmatprep.subr.bf16.mxu1 %v3735_v11  ;;  %v3823_v10 = vld [vmem:[#allocation8 + $0x20] ss:$16 sps:$4 sm:$0xff]   ;;  %v3826_v11 = vld [vmem:[#allocation8 + $0x28] ss:$16 sps:$4 sm:$0xff]  }
  0xa3   :  { %960 = vmatpush1.bf16.msra.mxu0 %v3730_v12  ;;  %1046 = vmatpush1.bf16.msra.mxu1 %v3733_v13  ;;  %v3915_v12 = vld [vmem:[#allocation5 + $0x4] ss:$16 sps:$4 sm:$0xff]  }
  0xa4   :  { %961 = vmatprep.subr.bf16.mxu0 %v3738_v14  ;;  %1047 = vmatprep.subr.bf16.mxu1 %v3741_v15  ;;  %v3831_v13 = vld [vmem:[#allocation8 + $0x44] ss:$16 sps:$4 sm:$0xff]   ;;  %v3834_v14 = vld [vmem:[#allocation8 + $0x4c] ss:$16 sps:$4 sm:$0xff]   ;;  %v3829_v15 = vld [vmem:[#allocation8 + $0x40] ss:$16 sps:$4 sm:$0xff]  }
  0xa7   :  { %962 = vmatpush1.bf16.msra.mxu0 %v3736_v16  ;;  %1048 = vmatpush1.bf16.msra.mxu1 %v3739_v17  ;;  %v3832_v16 = vld [vmem:[#allocation8 + $0x48] ss:$16 sps:$4 sm:$0xff]   ;;  %v3837_v17 = vld [vmem:[#allocation8 + $0x64] ss:$16 sps:$4 sm:$0xff]  }
  0xa8   :  { %963 = vmatprep.subr.bf16.mxu0 %v3744_v18  ;;  %1049 = vmatprep.subr.bf16.mxu1 %v3747_v19  ;;  %v3840_v18 = vld [vmem:[#allocation8 + $0x6c] ss:$16 sps:$4 sm:$0xff]   ;;  %v3835_v19 = vld [vmem:[#allocation8 + $0x60] ss:$16 sps:$4 sm:$0xff]  }
  0xab   :  { %964 = vmatpush1.bf16.msra.mxu0 %v3742_v20  ;;  %1050 = vmatpush1.bf16.msra.mxu1 %v3745_v21  ;;  %v3838_v20 = vld [vmem:[#allocation8 + $0x68] ss:$16 sps:$4 sm:$0xff]   ;;  %v3843_v21 = vld [vmem:[#allocation8 + $0x84] ss:$16 sps:$4 sm:$0xff]  }
  0xac   :  { %965 = vmatprep.subr.bf16.mxu0 %v3750_v22  ;;  %1051 = vmatprep.subr.bf16.mxu1 %v3753_v23  ;;  %v3846_v22 = vld [vmem:[#allocation8 + $0x8c] ss:$16 sps:$4 sm:$0xff]   ;;  %v3841_v23 = vld [vmem:[#allocation8 + $0x80] ss:$16 sps:$4 sm:$0xff]  }
  0xaf   :  { %966 = vmatpush1.bf16.msra.mxu0 %v3748_v24  ;;  %1052 = vmatpush1.bf16.msra.mxu1 %v3751_v25  ;;  %v3844_v24 = vld [vmem:[#allocation8 + $0x88] ss:$16 sps:$4 sm:$0xff]   ;;  %v3849_v25 = vld [vmem:[#allocation8 + $0xa4] ss:$16 sps:$4 sm:$0xff]  }
  0xb0   :  { %967 = vmatprep.subr.bf16.mxu0 %v3756_v26  ;;  %1053 = vmatprep.subr.bf16.mxu1 %v3759_v27  ;;  %v3852_v26 = vld [vmem:[#allocation8 + $0xac] ss:$16 sps:$4 sm:$0xff]   ;;  %v3847_v27 = vld [vmem:[#allocation8 + $0xa0] ss:$16 sps:$4 sm:$0xff]  }
  0xb3   :  { %968 = vmatpush1.bf16.msra.mxu0 %v3754_v28  ;;  %1054 = vmatpush1.bf16.msra.mxu1 %v3757_v29  ;;  %v3850_v28 = vld [vmem:[#allocation8 + $0xa8] ss:$16 sps:$4 sm:$0xff]   ;;  %v3855_v29 = vld [vmem:[#allocation8 + $0xc4] ss:$16 sps:$4 sm:$0xff]  }
  0xb4   :  { %969 = vmatprep.subr.bf16.mxu0 %v3762_v31  ;;  %1055 = vmatprep.subr.bf16.mxu1 %v3765_v32  ;;  %v3853_v31 = vld [vmem:[#allocation8 + $0xc0] ss:$16 sps:$4 sm:$0xff]   ;;  %v3856_v32 = vld [vmem:[#allocation8 + $0xc8] ss:$16 sps:$4 sm:$0xff]  }
  0xb7   :  { %970 = vmatpush1.bf16.msra.mxu0 %v3760_v33  ;;  %1056 = vmatpush1.bf16.msra.mxu1 %v3763_v34  ;;  %v3861_v33 = vld [vmem:[#allocation8 + $0xe4] ss:$16 sps:$4 sm:$0xff]   ;;  %v3864_v34 = vld [vmem:[#allocation8 + $0xec] ss:$16 sps:$4 sm:$0xff]  }
  0xb8   :  { %971 = vmatprep.subr.bf16.mxu0 %v3768_v35  ;;  %1057 = vmatprep.subr.bf16.mxu1 %v3771_v36  ;;  %v3859_v35 = vld [vmem:[#allocation8 + $0xe0] ss:$16 sps:$4 sm:$0xff]   ;;  %v3862_v36 = vld [vmem:[#allocation8 + $0xe8] ss:$16 sps:$4 sm:$0xff]  }
  0xbb   :  { %972 = vmatpush1.bf16.msra.mxu0 %v3766_v37  ;;  %1058 = vmatpush1.bf16.msra.mxu1 %v3769_v38  ;;  %v3867_v37 = vld [vmem:[#allocation8 + $0x104] ss:$16 sps:$4 sm:$0xff]   ;;  %v3870_v38 = vld [vmem:[#allocation8 + $0x10c] ss:$16 sps:$4 sm:$0xff]  }
  0xbc   :  { %973 = vmatprep.subr.bf16.mxu0 %v3774_v39  ;;  %1059 = vmatprep.subr.bf16.mxu1 %v3777_v40  ;;  %v3865_v39 = vld [vmem:[#allocation8 + $0x100] ss:$16 sps:$4 sm:$0xff]   ;;  %v3868_v40 = vld [vmem:[#allocation8 + $0x108] ss:$16 sps:$4 sm:$0xff]  }
  0xbf   :  { %974 = vmatpush1.bf16.msra.mxu0 %v3772_v41  ;;  %1060 = vmatpush1.bf16.msra.mxu1 %v3775_v42  ;;  %v3873_v41 = vld [vmem:[#allocation8 + $0x124] ss:$16 sps:$4 sm:$0xff]   ;;  %v3876_v42 = vld [vmem:[#allocation8 + $0x12c] ss:$16 sps:$4 sm:$0xff]  }
  0xc0   :  { %975 = vmatprep.subr.bf16.mxu0 %v3780_v43  ;;  %1061 = vmatprep.subr.bf16.mxu1 %v3783_v44  ;;  %v3871_v43 = vld [vmem:[#allocation8 + $0x120] ss:$16 sps:$4 sm:$0xff]   ;;  %v3874_v44 = vld [vmem:[#allocation8 + $0x128] ss:$16 sps:$4 sm:$0xff]  }
  0xc3   :  { %976 = vmatpush1.bf16.msra.mxu0 %v3778_v45  ;;  %1062 = vmatpush1.bf16.msra.mxu1 %v3781_v46  ;;  %v3879_v45 = vld [vmem:[#allocation8 + $0x144] ss:$16 sps:$4 sm:$0xff]   ;;  %v3882_v46 = vld [vmem:[#allocation8 + $0x14c] ss:$16 sps:$4 sm:$0xff]  }
  0xc4   :  { %977 = vmatprep.subr.bf16.mxu0 %v3786_v47  ;;  %1063 = vmatprep.subr.bf16.mxu1 %v3789_v48  ;;  %v3877_v47 = vld [vmem:[#allocation8 + $0x140] ss:$16 sps:$4 sm:$0xff]   ;;  %v3880_v48 = vld [vmem:[#allocation8 + $0x148] ss:$16 sps:$4 sm:$0xff]  }
  0xc7   :  { %978 = vmatpush1.bf16.msra.mxu0 %v3784_v49  ;;  %1064 = vmatpush1.bf16.msra.mxu1 %v3787_v50  ;;  %v3885_v49 = vld [vmem:[#allocation8 + $0x164] ss:$16 sps:$4 sm:$0xff]   ;;  %v3888_v50 = vld [vmem:[#allocation8 + $0x16c] ss:$16 sps:$4 sm:$0xff]  }
  0xc8   :  { %979 = vmatprep.subr.bf16.mxu0 %v3792_v51  ;;  %1065 = vmatprep.subr.bf16.mxu1 %v3795_v52  ;;  %v3883_v51 = vld [vmem:[#allocation8 + $0x160] ss:$16 sps:$4 sm:$0xff]   ;;  %v3886_v52 = vld [vmem:[#allocation8 + $0x168] ss:$16 sps:$4 sm:$0xff]  }
  0xcb   :  { %980 = vmatpush1.bf16.msra.mxu0 %v3790_v53  ;;  %1066 = vmatpush1.bf16.msra.mxu1 %v3793_v54  ;;  %v3891_v53 = vld [vmem:[#allocation8 + $0x184] ss:$16 sps:$4 sm:$0xff]   ;;  %v3894_v54 = vld [vmem:[#allocation8 + $0x18c] ss:$16 sps:$4 sm:$0xff]  }
  0xcc   :  { %981 = vmatprep.subr.bf16.mxu0 %v3798_v55  ;;  %1067 = vmatprep.subr.bf16.mxu1 %v3801_v56  ;;  %v3889_v55 = vld [vmem:[#allocation8 + $0x180] ss:$16 sps:$4 sm:$0xff]   ;;  %v3892_v56 = vld [vmem:[#allocation8 + $0x188] ss:$16 sps:$4 sm:$0xff]  }
  0xcf   :  { %982 = vmatpush1.bf16.msra.mxu0 %v3796_v57  ;;  %1068 = vmatpush1.bf16.msra.mxu1 %v3799_v58  ;;  %v3897_v57 = vld [vmem:[#allocation8 + $0x1a4] ss:$16 sps:$4 sm:$0xff]   ;;  %v3900_v58 = vld [vmem:[#allocation8 + $0x1ac] ss:$16 sps:$4 sm:$0xff]  }
  0xd0   :  { %983 = vmatprep.subr.bf16.mxu0 %v3804_v59  ;;  %1069 = vmatprep.subr.bf16.mxu1 %v3807_v60  ;;  %v3895_v59 = vld [vmem:[#allocation8 + $0x1a0] ss:$16 sps:$4 sm:$0xff]   ;;  %v3898_v60 = vld [vmem:[#allocation8 + $0x1a8] ss:$16 sps:$4 sm:$0xff]  }
  0xd3   :  { %984 = vmatpush1.bf16.msra.mxu0 %v3802_v61  ;;  %1070 = vmatpush1.bf16.msra.mxu1 %v3805_v62  ;;  %v3903_v61 = vld [vmem:[#allocation8 + $0x1c4] ss:$16 sps:$4 sm:$0xff]   ;;  %v3906_v62 = vld [vmem:[#allocation8 + $0x1cc] ss:$16 sps:$4 sm:$0xff]  }
  0xd4   :  { %985 = vmatprep.subr.bf16.mxu0 %v3810_v63  ;;  %1071 = vmatprep.subr.bf16.mxu1 %v3813_v0  ;;  %v3901_v63 = vld [vmem:[#allocation8 + $0x1c0] ss:$16 sps:$4 sm:$0xff]   ;;  %v3904_v0 = vld [vmem:[#allocation8 + $0x1c8] ss:$16 sps:$4 sm:$0xff]  }
  0xd7   :  { %986 = vmatpush1.bf16.msra.mxu0 %v3808_v1  ;;  %1072 = vmatpush1.bf16.msra.mxu1 %v3811_v2  ;;  %v3909_v1 = vld [vmem:[#allocation8 + $0x1e4] ss:$16 sps:$4 sm:$0xff]   ;;  %v3912_v2 = vld [vmem:[#allocation8 + $0x1ec] ss:$16 sps:$4 sm:$0xff]  }
  0xd8   :  { %1906 = vmatprep.subr.bf16.mxu0 %v3819_v3  ;;  %1992 = vmatprep.subr.bf16.mxu1 %v3822_v4  ;;  %v3907_v3 = vld [vmem:[#allocation8 + $0x1e0] ss:$16 sps:$4 sm:$0xff]   ;;  %v3910_v4 = vld [vmem:[#allocation8 + $0x1e8] ss:$16 sps:$4 sm:$0xff]  }
  0xda   :  { %988 = vmatmul.mubr.bf16.vlgmr.msra.gmra.mrb[0].mxu0 %v3814_v5  ;;  %1074 = vmatmul.mubr.bf16.vlgmr.msra.gmra.mrb[0].mxu1 %v3814_v5  ;;  %v3918_v5 = vld [vmem:[#allocation8 + $0x204] ss:$16 sps:$4 sm:$0xff]  }
  0xdb   :  { %1907 = vmatpush1.bf16.msra.mxu0 %v3817_v6  ;;  %1993 = vmatpush1.bf16.msra.mxu1 %v3820_v7  ;;  %v3921_v6 = vld [vmem:[#allocation8 + $0x20c] ss:$16 sps:$4 sm:$0xff]   ;;  %v3913_v7 = vld [vmem:[#allocation5] ss:$16 sps:$4 sm:$0xff]  }
  0xdc   :  { %1908 = vmatprep.subr.bf16.mxu0 %v3825_v8  ;;  %1994 = vmatprep.subr.bf16.mxu1 %v3828_v9  ;;  %v3916_v8 = vld [vmem:[#allocation8 + $0x200] ss:$16 sps:$4 sm:$0xff]   ;;  %v3919_v9 = vld [vmem:[#allocation8 + $0x208] ss:$16 sps:$4 sm:$0xff]  }
  0xdd   :  { %1938 = vmatprep.mubr.bf16.mxu0 %v3915_v12  ;;  %2024 = vmatprep.mubr.bf16.mxu1 %v3915_v12  ;;  %v4014_v12 = vld [vmem:[#allocation5 + $0xc] ss:$16 sps:$4 sm:$0xff]  }
  0xdf   :  { %1909 = vmatpush1.bf16.msra.mxu0 %v3823_v10  ;;  %1995 = vmatpush1.bf16.msra.mxu1 %v3826_v11  ;;  %v3924_v10 = vld [vmem:[#allocation8 + $0x224] ss:$16 sps:$4 sm:$0xff]   ;;  %v3927_v11 = vld [vmem:[#allocation8 + $0x22c] ss:$16 sps:$4 sm:$0xff]  }
  0xe0   :  { %1910 = vmatprep.subr.bf16.mxu0 %v3831_v13  ;;  %1996 = vmatprep.subr.bf16.mxu1 %v3834_v14  ;;  %v3922_v13 = vld [vmem:[#allocation8 + $0x220] ss:$16 sps:$4 sm:$0xff]   ;;  %v3925_v14 = vld [vmem:[#allocation8 + $0x228] ss:$16 sps:$4 sm:$0xff]  }
  0xe3   :  { %1911 = vmatpush1.bf16.msra.mxu0 %v3829_v15  ;;  %1997 = vmatpush1.bf16.msra.mxu1 %v3832_v16  ;;  %v3930_v15 = vld [vmem:[#allocation8 + $0x244] ss:$16 sps:$4 sm:$0xff]   ;;  %v3933_v16 = vld [vmem:[#allocation8 + $0x24c] ss:$16 sps:$4 sm:$0xff]  }
  0xe4   :  { %1912 = vmatprep.subr.bf16.mxu0 %v3837_v17  ;;  %1998 = vmatprep.subr.bf16.mxu1 %v3840_v18  ;;  %v3928_v17 = vld [vmem:[#allocation8 + $0x240] ss:$16 sps:$4 sm:$0xff]   ;;  %v3931_v18 = vld [vmem:[#allocation8 + $0x248] ss:$16 sps:$4 sm:$0xff]  }
  0xe7   :  { %1913 = vmatpush1.bf16.msra.mxu0 %v3835_v19  ;;  %1999 = vmatpush1.bf16.msra.mxu1 %v3838_v20  ;;  %v3936_v19 = vld [vmem:[#allocation8 + $0x264] ss:$16 sps:$4 sm:$0xff]   ;;  %v3939_v20 = vld [vmem:[#allocation8 + $0x26c] ss:$16 sps:$4 sm:$0xff]  }
  0xe8   :  { %1914 = vmatprep.subr.bf16.mxu0 %v3843_v21  ;;  %2000 = vmatprep.subr.bf16.mxu1 %v3846_v22  ;;  %v3934_v21 = vld [vmem:[#allocation8 + $0x260] ss:$16 sps:$4 sm:$0xff]   ;;  %v3937_v22 = vld [vmem:[#allocation8 + $0x268] ss:$16 sps:$4 sm:$0xff]  }
  0xeb   :  { %1915 = vmatpush1.bf16.msra.mxu0 %v3841_v23  ;;  %2001 = vmatpush1.bf16.msra.mxu1 %v3844_v24  ;;  %v3942_v23 = vld [vmem:[#allocation8 + $0x284] ss:$16 sps:$4 sm:$0xff]   ;;  %v3945_v24 = vld [vmem:[#allocation8 + $0x28c] ss:$16 sps:$4 sm:$0xff]  }
  0xec   :  { %1916 = vmatprep.subr.bf16.mxu0 %v3849_v25  ;;  %2002 = vmatprep.subr.bf16.mxu1 %v3852_v26  ;;  %v3940_v25 = vld [vmem:[#allocation8 + $0x280] ss:$16 sps:$4 sm:$0xff]   ;;  %v3943_v26 = vld [vmem:[#allocation8 + $0x288] ss:$16 sps:$4 sm:$0xff]  }
  0xef   :  { %1917 = vmatpush1.bf16.msra.mxu0 %v3847_v27  ;;  %2003 = vmatpush1.bf16.msra.mxu1 %v3850_v28  ;;  %v3948_v27 = vld [vmem:[#allocation8 + $0x2a4] ss:$16 sps:$4 sm:$0xff]   ;;  %v3951_v28 = vld [vmem:[#allocation8 + $0x2ac] ss:$16 sps:$4 sm:$0xff]  }
  0xf0   :  { %1918 = vmatprep.subr.bf16.mxu0 %v3855_v29  ;;  %2004 = vmatprep.subr.bf16.mxu1 %v3858_v30  ;;  %v3946_v29 = vld [vmem:[#allocation8 + $0x2a0] ss:$16 sps:$4 sm:$0xff]   ;;  %v3949_v30 = vld [vmem:[#allocation8 + $0x2a8] ss:$16 sps:$4 sm:$0xff]  }
  0xf3   :  { %1919 = vmatpush1.bf16.msra.mxu0 %v3853_v31  ;;  %2005 = vmatpush1.bf16.msra.mxu1 %v3856_v32  ;;  %v3954_v31 = vld [vmem:[#allocation8 + $0x2c4] ss:$16 sps:$4 sm:$0xff]   ;;  %v3957_v32 = vld [vmem:[#allocation8 + $0x2cc] ss:$16 sps:$4 sm:$0xff]  }
  0xf4   :  { %1920 = vmatprep.subr.bf16.mxu0 %v3861_v33  ;;  %2006 = vmatprep.subr.bf16.mxu1 %v3864_v34  ;;  %v3952_v33 = vld [vmem:[#allocation8 + $0x2c0] ss:$16 sps:$4 sm:$0xff]   ;;  %v3955_v34 = vld [vmem:[#allocation8 + $0x2c8] ss:$16 sps:$4 sm:$0xff]  }
  0xf7   :  { %1921 = vmatpush1.bf16.msra.mxu0 %v3859_v35  ;;  %2007 = vmatpush1.bf16.msra.mxu1 %v3862_v36  ;;  %v3960_v35 = vld [vmem:[#allocation8 + $0x2e4] ss:$16 sps:$4 sm:$0xff]   ;;  %v3963_v36 = vld [vmem:[#allocation8 + $0x2ec] ss:$16 sps:$4 sm:$0xff]  }
  0xf8   :  { %1922 = vmatprep.subr.bf16.mxu0 %v3867_v37  ;;  %2008 = vmatprep.subr.bf16.mxu1 %v3870_v38  ;;  %v3958_v37 = vld [vmem:[#allocation8 + $0x2e0] ss:$16 sps:$4 sm:$0xff]   ;;  %v3961_v38 = vld [vmem:[#allocation8 + $0x2e8] ss:$16 sps:$4 sm:$0xff]  }
  0xfb   :  { %1923 = vmatpush1.bf16.msra.mxu0 %v3865_v39  ;;  %2009 = vmatpush1.bf16.msra.mxu1 %v3868_v40  ;;  %v3966_v39 = vld [vmem:[#allocation8 + $0x304] ss:$16 sps:$4 sm:$0xff]   ;;  %v3969_v40 = vld [vmem:[#allocation8 + $0x30c] ss:$16 sps:$4 sm:$0xff]  }
  0xfc   :  { %1924 = vmatprep.subr.bf16.mxu0 %v3873_v41  ;;  %2010 = vmatprep.subr.bf16.mxu1 %v3876_v42  ;;  %v3964_v41 = vld [vmem:[#allocation8 + $0x300] ss:$16 sps:$4 sm:$0xff]   ;;  %v3967_v42 = vld [vmem:[#allocation8 + $0x308] ss:$16 sps:$4 sm:$0xff]  }
  0xff   :  { %1925 = vmatpush1.bf16.msra.mxu0 %v3871_v43  ;;  %2011 = vmatpush1.bf16.msra.mxu1 %v3874_v44  ;;  %v3972_v43 = vld [vmem:[#allocation8 + $0x324] ss:$16 sps:$4 sm:$0xff]   ;;  %v3975_v44 = vld [vmem:[#allocation8 + $0x32c] ss:$16 sps:$4 sm:$0xff]  }
 0x100   :  { %1926 = vmatprep.subr.bf16.mxu0 %v3879_v45  ;;  %2012 = vmatprep.subr.bf16.mxu1 %v3882_v46  ;;  %v3970_v45 = vld [vmem:[#allocation8 + $0x320] ss:$16 sps:$4 sm:$0xff]   ;;  %v3973_v46 = vld [vmem:[#allocation8 + $0x328] ss:$16 sps:$4 sm:$0xff]  }
 0x103   :  { %1927 = vmatpush1.bf16.msra.mxu0 %v3877_v47  ;;  %2013 = vmatpush1.bf16.msra.mxu1 %v3880_v48  ;;  %v3978_v47 = vld [vmem:[#allocation8 + $0x344] ss:$16 sps:$4 sm:$0xff]   ;;  %v3981_v48 = vld [vmem:[#allocation8 + $0x34c] ss:$16 sps:$4 sm:$0xff]  }
 0x104   :  { %1928 = vmatprep.subr.bf16.mxu0 %v3885_v49  ;;  %2014 = vmatprep.subr.bf16.mxu1 %v3888_v50  ;;  %v3976_v49 = vld [vmem:[#allocation8 + $0x340] ss:$16 sps:$4 sm:$0xff]   ;;  %v3979_v50 = vld [vmem:[#allocation8 + $0x348] ss:$16 sps:$4 sm:$0xff]  }
 0x107   :  { %1929 = vmatpush1.bf16.msra.mxu0 %v3883_v51  ;;  %2015 = vmatpush1.bf16.msra.mxu1 %v3886_v52  ;;  %v3984_v51 = vld [vmem:[#allocation8 + $0x364] ss:$16 sps:$4 sm:$0xff]   ;;  %v3987_v52 = vld [vmem:[#allocation8 + $0x36c] ss:$16 sps:$4 sm:$0xff]  }
 0x108   :  { %1930 = vmatprep.subr.bf16.mxu0 %v3891_v53  ;;  %2016 = vmatprep.subr.bf16.mxu1 %v3894_v54  ;;  %v3982_v53 = vld [vmem:[#allocation8 + $0x360] ss:$16 sps:$4 sm:$0xff]   ;;  %v3985_v54 = vld [vmem:[#allocation8 + $0x368] ss:$16 sps:$4 sm:$0xff]  }
 0x10b   :  { %1931 = vmatpush1.bf16.msra.mxu0 %v3889_v55  ;;  %2017 = vmatpush1.bf16.msra.mxu1 %v3892_v56  ;;  %v3990_v55 = vld [vmem:[#allocation8 + $0x384] ss:$16 sps:$4 sm:$0xff]   ;;  %v3993_v56 = vld [vmem:[#allocation8 + $0x38c] ss:$16 sps:$4 sm:$0xff]  }
 0x10c   :  { %1932 = vmatprep.subr.bf16.mxu0 %v3897_v57  ;;  %2018 = vmatprep.subr.bf16.mxu1 %v3900_v58  ;;  %v3988_v57 = vld [vmem:[#allocation8 + $0x380] ss:$16 sps:$4 sm:$0xff]   ;;  %v3991_v58 = vld [vmem:[#allocation8 + $0x388] ss:$16 sps:$4 sm:$0xff]  }
 0x10f   :  { %1933 = vmatpush1.bf16.msra.mxu0 %v3895_v59  ;;  %2019 = vmatpush1.bf16.msra.mxu1 %v3898_v60  ;;  %v3996_v59 = vld [vmem:[#allocation8 + $0x3a4] ss:$16 sps:$4 sm:$0xff]   ;;  %v3999_v60 = vld [vmem:[#allocation8 + $0x3ac] ss:$16 sps:$4 sm:$0xff]  }
 0x110   :  { %1934 = vmatprep.subr.bf16.mxu0 %v3903_v61  ;;  %2020 = vmatprep.subr.bf16.mxu1 %v3906_v62  ;;  %v3994_v61 = vld [vmem:[#allocation8 + $0x3a0] ss:$16 sps:$4 sm:$0xff]   ;;  %v3997_v62 = vld [vmem:[#allocation8 + $0x3a8] ss:$16 sps:$4 sm:$0xff]  }
 0x113   :  { %1935 = vmatpush1.bf16.msra.mxu0 %v3901_v63  ;;  %2021 = vmatpush1.bf16.msra.mxu1 %v3904_v0  ;;  %v4002_v63 = vld [vmem:[#allocation8 + $0x3c4] ss:$16 sps:$4 sm:$0xff]   ;;  %v4005_v0 = vld [vmem:[#allocation8 + $0x3cc] ss:$16 sps:$4 sm:$0xff]  }
 0x114   :  { %1936 = vmatprep.subr.bf16.mxu0 %v3909_v1  ;;  %2022 = vmatprep.subr.bf16.mxu1 %v3912_v2  ;;  %v4000_v1 = vld [vmem:[#allocation8 + $0x3c0] ss:$16 sps:$4 sm:$0xff]   ;;  %v4003_v2 = vld [vmem:[#allocation8 + $0x3c8] ss:$16 sps:$4 sm:$0xff]  }
 0x117   :  { %1937 = vmatpush1.bf16.msra.mxu0 %v3907_v3  ;;  %2023 = vmatpush1.bf16.msra.mxu1 %v3910_v4  ;;  %v4008_v3 = vld [vmem:[#allocation8 + $0x3e4] ss:$16 sps:$4 sm:$0xff]   ;;  %v4011_v4 = vld [vmem:[#allocation8 + $0x3ec] ss:$16 sps:$4 sm:$0xff]  }
 0x118   :  { %1949 = vmatprep.subr.bf16.mxu0 %v3918_v5  ;;  %2035 = vmatprep.subr.bf16.mxu1 %v3921_v6  ;;  %v4006_v5 = vld [vmem:[#allocation8 + $0x3e0] ss:$16 sps:$4 sm:$0xff]   ;;  %v4009_v6 = vld [vmem:[#allocation8 + $0x3e8] ss:$16 sps:$4 sm:$0xff]  }
 0x11a   :  { %1939 = vmatmul.mubr.bf16.vlgmr.msra.gmra.mrb[4].mxu0 %v3913_v7  ;;  %2025 = vmatmul.mubr.bf16.vlgmr.msra.gmra.mrb[4].mxu1 %v3913_v7  ;;  %v4017_v7 = vld [vmem:[#allocation10 + $0x4] ss:$16 sps:$4 sm:$0xff]  }
 0x11b   :  { %1950 = vmatpush1.bf16.msra.mxu0 %v3916_v8  ;;  %2036 = vmatpush1.bf16.msra.mxu1 %v3919_v9  ;;  %v4020_v8 = vld [vmem:[#allocation10 + $0xc] ss:$16 sps:$4 sm:$0xff]   ;;  %v4012_v9 = vld [vmem:[#allocation5 + $0x8] ss:$16 sps:$4 sm:$0xff]  }
 0x11c   :  { %1951 = vmatprep.subr.bf16.mxu0 %v3924_v10  ;;  %2037 = vmatprep.subr.bf16.mxu1 %v3927_v11  ;;  %v4015_v10 = vld [vmem:[#allocation10] ss:$16 sps:$4 sm:$0xff]   ;;  %v4018_v11 = vld [vmem:[#allocation10 + $0x8] ss:$16 sps:$4 sm:$0xff]  }
 0x11d   :  { %1981 = vmatprep.mubr.bf16.mxu0 %v4014_v12  ;;  %2067 = vmatprep.mubr.bf16.mxu1 %v4014_v12  ;;  %v4023_v12 = vld [vmem:[#allocation10 + $0x24] ss:$16 sps:$4 sm:$0xff]  }
 0x11f   :  { %1952 = vmatpush1.bf16.msra.mxu0 %v3922_v13  ;;  %2038 = vmatpush1.bf16.msra.mxu1 %v3925_v14  ;;  %v4026_v13 = vld [vmem:[#allocation10 + $0x2c] ss:$16 sps:$4 sm:$0xff]   ;;  %v4021_v14 = vld [vmem:[#allocation10 + $0x20] ss:$16 sps:$4 sm:$0xff]  }
 0x120   :  { %1953 = vmatprep.subr.bf16.mxu0 %v3930_v15  ;;  %2039 = vmatprep.subr.bf16.mxu1 %v3933_v16  ;;  %v4024_v15 = vld [vmem:[#allocation10 + $0x28] ss:$16 sps:$4 sm:$0xff]   ;;  %v4029_v16 = vld [vmem:[#allocation10 + $0x44] ss:$16 sps:$4 sm:$0xff]  }
 0x123   :  { %1954 = vmatpush1.bf16.msra.mxu0 %v3928_v17  ;;  %2040 = vmatpush1.bf16.msra.mxu1 %v3931_v18  ;;  %v4032_v17 = vld [vmem:[#allocation10 + $0x4c] ss:$16 sps:$4 sm:$0xff]   ;;  %v4027_v18 = vld [vmem:[#allocation10 + $0x40] ss:$16 sps:$4 sm:$0xff]  }
 0x124   :  { %1955 = vmatprep.subr.bf16.mxu0 %v3936_v19  ;;  %2041 = vmatprep.subr.bf16.mxu1 %v3939_v20  ;;  %v4030_v19 = vld [vmem:[#allocation10 + $0x48] ss:$16 sps:$4 sm:$0xff]   ;;  %v4035_v20 = vld [vmem:[#allocation10 + $0x64] ss:$16 sps:$4 sm:$0xff]  }
 0x127   :  { %1956 = vmatpush1.bf16.msra.mxu0 %v3934_v21  ;;  %2042 = vmatpush1.bf16.msra.mxu1 %v3937_v22  ;;  %v4038_v21 = vld [vmem:[#allocation10 + $0x6c] ss:$16 sps:$4 sm:$0xff]   ;;  %v4033_v22 = vld [vmem:[#allocation10 + $0x60] ss:$16 sps:$4 sm:$0xff]  }
 0x128   :  { %1957 = vmatprep.subr.bf16.mxu0 %v3942_v23  ;;  %2043 = vmatprep.subr.bf16.mxu1 %v3945_v24  ;;  %v4036_v23 = vld [vmem:[#allocation10 + $0x68] ss:$16 sps:$4 sm:$0xff]   ;;  %v4041_v24 = vld [vmem:[#allocation10 + $0x84] ss:$16 sps:$4 sm:$0xff]  }
 0x12b   :  { %1958 = vmatpush1.bf16.msra.mxu0 %v3940_v25  ;;  %2044 = vmatpush1.bf16.msra.mxu1 %v3943_v26  ;;  %v4044_v25 = vld [vmem:[#allocation10 + $0x8c] ss:$16 sps:$4 sm:$0xff]   ;;  %v4039_v26 = vld [vmem:[#allocation10 + $0x80] ss:$16 sps:$4 sm:$0xff]  }
 0x12c   :  { %1959 = vmatprep.subr.bf16.mxu0 %v3948_v27  ;;  %2045 = vmatprep.subr.bf16.mxu1 %v3951_v28  ;;  %v4042_v27 = vld [vmem:[#allocation10 + $0x88] ss:$16 sps:$4 sm:$0xff]   ;;  %v4047_v28 = vld [vmem:[#allocation10 + $0xa4] ss:$16 sps:$4 sm:$0xff]  }
 0x12f   :  { %1960 = vmatpush1.bf16.msra.mxu0 %v3946_v29  ;;  %2046 = vmatpush1.bf16.msra.mxu1 %v3949_v30  ;;  %v4050_v29 = vld [vmem:[#allocation10 + $0xac] ss:$16 sps:$4 sm:$0xff]   ;;  %v4045_v30 = vld [vmem:[#allocation10 + $0xa0] ss:$16 sps:$4 sm:$0xff]  }
 0x130   :  { %1961 = vmatprep.subr.bf16.mxu0 %v3954_v31  ;;  %2047 = vmatprep.subr.bf16.mxu1 %v3957_v32  ;;  %v4048_v31 = vld [vmem:[#allocation10 + $0xa8] ss:$16 sps:$4 sm:$0xff]   ;;  %v4053_v32 = vld [vmem:[#allocation10 + $0xc4] ss:$16 sps:$4 sm:$0xff]  }
 0x133   :  { %1962 = vmatpush1.bf16.msra.mxu0 %v3952_v33  ;;  %2048 = vmatpush1.bf16.msra.mxu1 %v3955_v34  ;;  %v4056_v33 = vld [vmem:[#allocation10 + $0xcc] ss:$16 sps:$4 sm:$0xff]   ;;  %v4051_v34 = vld [vmem:[#allocation10 + $0xc0] ss:$16 sps:$4 sm:$0xff]  }
 0x134   :  { %1963 = vmatprep.subr.bf16.mxu0 %v3960_v35  ;;  %2049 = vmatprep.subr.bf16.mxu1 %v3963_v36  ;;  %v4054_v35 = vld [vmem:[#allocation10 + $0xc8] ss:$16 sps:$4 sm:$0xff]   ;;  %v4059_v36 = vld [vmem:[#allocation10 + $0xe4] ss:$16 sps:$4 sm:$0xff]  }
 0x137   :  { %1964 = vmatpush1.bf16.msra.mxu0 %v3958_v37  ;;  %2050 = vmatpush1.bf16.msra.mxu1 %v3961_v38  ;;  %v4062_v37 = vld [vmem:[#allocation10 + $0xec] ss:$16 sps:$4 sm:$0xff]   ;;  %v4057_v38 = vld [vmem:[#allocation10 + $0xe0] ss:$16 sps:$4 sm:$0xff]  }
 0x138   :  { %1965 = vmatprep.subr.bf16.mxu0 %v3966_v39  ;;  %2051 = vmatprep.subr.bf16.mxu1 %v3969_v40  ;;  %v4060_v39 = vld [vmem:[#allocation10 + $0xe8] ss:$16 sps:$4 sm:$0xff]   ;;  %v4065_v40 = vld [vmem:[#allocation10 + $0x104] ss:$16 sps:$4 sm:$0xff]  }
 0x13b   :  { %1966 = vmatpush1.bf16.msra.mxu0 %v3964_v41  ;;  %2052 = vmatpush1.bf16.msra.mxu1 %v3967_v42  ;;  %v4068_v41 = vld [vmem:[#allocation10 + $0x10c] ss:$16 sps:$4 sm:$0xff]   ;;  %v4063_v42 = vld [vmem:[#allocation10 + $0x100] ss:$16 sps:$4 sm:$0xff]  }
 0x13c   :  { %1967 = vmatprep.subr.bf16.mxu0 %v3972_v43  ;;  %2053 = vmatprep.subr.bf16.mxu1 %v3975_v44  ;;  %v4066_v43 = vld [vmem:[#allocation10 + $0x108] ss:$16 sps:$4 sm:$0xff]   ;;  %v4071_v44 = vld [vmem:[#allocation10 + $0x124] ss:$16 sps:$4 sm:$0xff]  }
 0x13f   :  { %1968 = vmatpush1.bf16.msra.mxu0 %v3970_v45  ;;  %2054 = vmatpush1.bf16.msra.mxu1 %v3973_v46  ;;  %v4074_v45 = vld [vmem:[#allocation10 + $0x12c] ss:$16 sps:$4 sm:$0xff]   ;;  %v4069_v46 = vld [vmem:[#allocation10 + $0x120] ss:$16 sps:$4 sm:$0xff]  }
 0x140   :  { %1969 = vmatprep.subr.bf16.mxu0 %v3978_v47  ;;  %2055 = vmatprep.subr.bf16.mxu1 %v3981_v48  ;;  %v4072_v47 = vld [vmem:[#allocation10 + $0x128] ss:$16 sps:$4 sm:$0xff]   ;;  %v4077_v48 = vld [vmem:[#allocation10 + $0x144] ss:$16 sps:$4 sm:$0xff]  }
 0x143   :  { %1970 = vmatpush1.bf16.msra.mxu0 %v3976_v49  ;;  %2056 = vmatpush1.bf16.msra.mxu1 %v3979_v50  ;;  %v4080_v49 = vld [vmem:[#allocation10 + $0x14c] ss:$16 sps:$4 sm:$0xff]   ;;  %v4075_v50 = vld [vmem:[#allocation10 + $0x140] ss:$16 sps:$4 sm:$0xff]  }
 0x144   :  { %1971 = vmatprep.subr.bf16.mxu0 %v3984_v51  ;;  %2057 = vmatprep.subr.bf16.mxu1 %v3987_v52  ;;  %v4078_v51 = vld [vmem:[#allocation10 + $0x148] ss:$16 sps:$4 sm:$0xff]   ;;  %v4083_v52 = vld [vmem:[#allocation10 + $0x164] ss:$16 sps:$4 sm:$0xff]  }
 0x147   :  { %1972 = vmatpush1.bf16.msra.mxu0 %v3982_v53  ;;  %2058 = vmatpush1.bf16.msra.mxu1 %v3985_v54  ;;  %v4086_v53 = vld [vmem:[#allocation10 + $0x16c] ss:$16 sps:$4 sm:$0xff]   ;;  %v4081_v54 = vld [vmem:[#allocation10 + $0x160] ss:$16 sps:$4 sm:$0xff]  }
 0x148   :  { %1973 = vmatprep.subr.bf16.mxu0 %v3990_v55  ;;  %2059 = vmatprep.subr.bf16.mxu1 %v3993_v56  ;;  %v4084_v55 = vld [vmem:[#allocation10 + $0x168] ss:$16 sps:$4 sm:$0xff]   ;;  %v4089_v56 = vld [vmem:[#allocation10 + $0x184] ss:$16 sps:$4 sm:$0xff]  }
 0x14b   :  { %1974 = vmatpush1.bf16.msra.mxu0 %v3988_v57  ;;  %2060 = vmatpush1.bf16.msra.mxu1 %v3991_v58  ;;  %v4092_v57 = vld [vmem:[#allocation10 + $0x18c] ss:$16 sps:$4 sm:$0xff]   ;;  %v4087_v58 = vld [vmem:[#allocation10 + $0x180] ss:$16 sps:$4 sm:$0xff]  }
 0x14c   :  { %1975 = vmatprep.subr.bf16.mxu0 %v3996_v59  ;;  %2061 = vmatprep.subr.bf16.mxu1 %v3999_v60  ;;  %v4090_v59 = vld [vmem:[#allocation10 + $0x188] ss:$16 sps:$4 sm:$0xff]   ;;  %v232_v60 = vlaneseq }
 0x14f   :  { %1976 = vmatpush1.bf16.msra.mxu0 %v3994_v61  ;;  %2062 = vmatpush1.bf16.msra.mxu1 %v3997_v62  ;;  %v233_v61 = vshrl.u32 %v232_v60, 7 }
 0x150   :  { %1977 = vmatprep.subr.bf16.mxu0 %v4002_v63  ;;  %2063 = vmatprep.subr.bf16.mxu1 %v4005_v0  ;;  %v230_v63 = vld [vmem:[%s4578_s3] sm:$0xf] }
 0x151   :  { %v4521_v62 = vsub.s32 2, %v233_v61 }
 0x153   :  { %1978 = vmatpush1.bf16.msra.mxu0 %v4000_v1  ;;  %2064 = vmatpush1.bf16.msra.mxu1 %v4003_v2  ;;  %v243_v0 = vrot.slane %v230_v63, %v4521_v62  ;;  %v4095_v1 = vld [vmem:[#allocation10 + $0x1a4] ss:$16 sps:$4 sm:$0xff]   ;;  %v4098_v2 = vld [vmem:[#allocation10 + $0x1ac] ss:$16 sps:$4 sm:$0xff]  }
 0x154   :  { %1979 = vmatprep.subr.bf16.mxu0 %v4008_v3  ;;  %2065 = vmatprep.subr.bf16.mxu1 %v4011_v4  ;;  %v4093_v3 = vld [vmem:[#allocation10 + $0x1a0] ss:$16 sps:$4 sm:$0xff]   ;;  %v4096_v4 = vld [vmem:[#allocation10 + $0x1a8] ss:$16 sps:$4 sm:$0xff]  }
 0x157   :  { %1980 = vmatpush1.bf16.msra.mxu0 %v4006_v5  ;;  %2066 = vmatpush1.bf16.msra.mxu1 %v4009_v6 }
 0x158   :  { %2888 = vmatprep.subr.bf16.mxu0 %v4017_v7  ;;  %2974 = vmatprep.subr.bf16.mxu1 %v4020_v8 }
 0x15a   :  { %1982 = vmatmul.mubr.bf16.vlgmr.msra.gmra.mrb[4].mxu0 %v4012_v9  ;;  %2068 = vmatmul.mubr.bf16.vlgmr.msra.gmra.mrb[4].mxu1 %v4012_v9 }
 0x15b   :  { %2889 = vmatpush1.bf16.msra.mxu0 %v4015_v10  ;;  %2975 = vmatpush1.bf16.msra.mxu1 %v4018_v11 }
 0x15c   :  { %2890 = vmatprep.subr.bf16.mxu0 %v4023_v12  ;;  %2976 = vmatprep.subr.bf16.mxu1 %v4026_v13  ;;  %v4101_v12 = vld [vmem:[#allocation10 + $0x1c4] ss:$16 sps:$4 sm:$0xff]   ;;  %v4104_v13 = vld [vmem:[#allocation10 + $0x1cc] ss:$16 sps:$4 sm:$0xff]  }
 0x15f   :  { %2891 = vmatpush1.bf16.msra.mxu0 %v4021_v14  ;;  %2977 = vmatpush1.bf16.msra.mxu1 %v4024_v15 }
 0x160   :  { %2892 = vmatprep.subr.bf16.mxu0 %v4029_v16  ;;  %2978 = vmatprep.subr.bf16.mxu1 %v4032_v17  ;;  %v4099_v17 = vld [vmem:[#allocation10 + $0x1c0] ss:$16 sps:$4 sm:$0xff]  }
 0x163   :  { %2893 = vmatpush1.bf16.msra.mxu0 %v4027_v18  ;;  %2979 = vmatpush1.bf16.msra.mxu1 %v4030_v19  ;;  %v4102_v18 = vld [vmem:[#allocation10 + $0x1c8] ss:$16 sps:$4 sm:$0xff]   ;;  %v4107_v19 = vld [vmem:[#allocation10 + $0x1e4] ss:$16 sps:$4 sm:$0xff]  }
 0x164   :  { %2894 = vmatprep.subr.bf16.mxu0 %v4035_v20  ;;  %2980 = vmatprep.subr.bf16.mxu1 %v4038_v21  ;;  %v4110_v20 = vld [vmem:[#allocation10 + $0x1ec] ss:$16 sps:$4 sm:$0xff]   ;;  %v4105_v21 = vld [vmem:[#allocation10 + $0x1e0] ss:$16 sps:$4 sm:$0xff]  }
 0x167   :  { %2895 = vmatpush1.bf16.msra.mxu0 %v4033_v22  ;;  %2981 = vmatpush1.bf16.msra.mxu1 %v4036_v23  ;;  %v4108_v22 = vld [vmem:[#allocation10 + $0x1e8] ss:$16 sps:$4 sm:$0xff]   ;;  %v4113_v23 = vld [vmem:[#allocation10 + $0x204] ss:$16 sps:$4 sm:$0xff]  }
 0x168   :  { %2896 = vmatprep.subr.bf16.mxu0 %v4041_v24  ;;  %2982 = vmatprep.subr.bf16.mxu1 %v4044_v25  ;;  %v4116_v24 = vld [vmem:[#allocation10 + $0x20c] ss:$16 sps:$4 sm:$0xff]   ;;  %v4531_v25 = vsub.s32 0, %v233_v61 }
 0x16b   :  { %2897 = vmatpush1.bf16.msra.mxu0 %v4039_v26  ;;  %2983 = vmatpush1.bf16.msra.mxu1 %v4042_v27  ;;  %v4533_v26 = vsub.s32 1, %v233_v61  ;;  %v4535_v27 = vsub.s32 3, %v233_v61 }
 0x16c   :  { %2898 = vmatprep.subr.bf16.mxu0 %v4047_v28  ;;  %2984 = vmatprep.subr.bf16.mxu1 %v4050_v29  ;;  %v235_v28 = vrot.slane %v230_v63, %v4531_v25 }
 0x16d   :  { %v239_v29 = vrot.slane %v230_v63, %v4533_v26 }
 0x16f   :  { %2899 = vmatpush1.bf16.msra.mxu0 %v4045_v30  ;;  %2985 = vmatpush1.bf16.msra.mxu1 %v4048_v31  ;;  %v247_v30 = vrot.slane %v230_v63, %v4535_v27  ;;  %v1224_v31 = vld [vmem:[%s4580_s5] sm:$0xf] }
 0x170   :  { %2900 = vmatprep.subr.bf16.mxu0 %v4053_v32  ;;  %2986 = vmatprep.subr.bf16.mxu1 %v4056_v33 }
 0x173   :  { %2901 = vmatpush1.bf16.msra.mxu0 %v4051_v34  ;;  %2987 = vmatpush1.bf16.msra.mxu1 %v4054_v35 }
 0x174   :  { %2902 = vmatprep.subr.bf16.mxu0 %v4059_v36  ;;  %2988 = vmatprep.subr.bf16.mxu1 %v4062_v37  ;;  %v1229_v36 = vrot.slane %v1224_v31, %v4531_v25  ;;  %v1237_v37 = vrot.slane %v1224_v31, %v4521_v62 }
 0x177   :  { %2903 = vmatpush1.bf16.msra.mxu0 %v4057_v38  ;;  %2989 = vmatpush1.bf16.msra.mxu1 %v4060_v39 }
 0x178   :  { %2904 = vmatprep.subr.bf16.mxu0 %v4065_v40  ;;  %2990 = vmatprep.subr.bf16.mxu1 %v4068_v41  ;;  %v1233_v40 = vrot.slane %v1224_v31, %v4533_v26  ;;  %v1241_v41 = vrot.slane %v1224_v31, %v4535_v27  ;;  %v4120_v31 = vld [vmem:[#allocation10 + $0x228] ss:$16 sps:$4 sm:$0xff]  }
 0x17b   :  { %2905 = vmatpush1.bf16.msra.mxu0 %v4063_v42  ;;  %2991 = vmatpush1.bf16.msra.mxu1 %v4066_v43 }
 0x17c   :  { %2906 = vmatprep.subr.bf16.mxu0 %v4071_v44  ;;  %2992 = vmatprep.subr.bf16.mxu1 %v4074_v45 }
 0x17f   :  { %2907 = vmatpush1.bf16.msra.mxu0 %v4069_v46  ;;  %2993 = vmatpush1.bf16.msra.mxu1 %v4072_v47 }
 0x180   :  { %2908 = vmatprep.subr.bf16.mxu0 %v4077_v48  ;;  %2994 = vmatprep.subr.bf16.mxu1 %v4080_v49 }
 0x183   :  { %2909 = vmatpush1.bf16.msra.mxu0 %v4075_v50  ;;  %2995 = vmatpush1.bf16.msra.mxu1 %v4078_v51 }
 0x184   :  { %2910 = vmatprep.subr.bf16.mxu0 %v4083_v52  ;;  %2996 = vmatprep.subr.bf16.mxu1 %v4086_v53 }
 0x187   :  { %2911 = vmatpush1.bf16.msra.mxu0 %v4081_v54  ;;  %2997 = vmatpush1.bf16.msra.mxu1 %v4084_v55 }
 0x188   :  { %2912 = vmatprep.subr.bf16.mxu0 %v4089_v56  ;;  %2998 = vmatprep.subr.bf16.mxu1 %v4092_v57 }
 0x18b   :  { %2913 = vmatpush1.bf16.msra.mxu0 %v4087_v58  ;;  %2999 = vmatpush1.bf16.msra.mxu1 %v4090_v59 }
 0x18c   :  { %2914 = vmatprep.subr.bf16.mxu0 %v4095_v1  ;;  %3000 = vmatprep.subr.bf16.mxu1 %v4098_v2 }
 0x18f   :  { %2915 = vmatpush1.bf16.msra.mxu0 %v4093_v3  ;;  %3001 = vmatpush1.bf16.msra.mxu1 %v4096_v4 }
 0x190   :  { %2916 = vmatprep.subr.bf16.mxu0 %v4101_v12  ;;  %3002 = vmatprep.subr.bf16.mxu1 %v4104_v13 }
 0x193   :  { %2917 = vmatpush1.bf16.msra.mxu0 %v4099_v17  ;;  %3003 = vmatpush1.bf16.msra.mxu1 %v4102_v18 }
 0x194   :  { %2918 = vmatprep.subr.bf16.mxu0 %v4107_v19  ;;  %3004 = vmatprep.subr.bf16.mxu1 %v4110_v20 }
 0x197   :  { %2919 = vmatpush1.bf16.msra.mxu0 %v4105_v21  ;;  %3005 = vmatpush1.bf16.msra.mxu1 %v4108_v22  ;;  %v4111_v22 = vld [vmem:[#allocation10 + $0x200] ss:$16 sps:$4 sm:$0xff]  }
 0x198   :  { %2931 = vmatprep.subr.bf16.mxu0 %v4113_v23  ;;  %3017 = vmatprep.subr.bf16.mxu1 %v4116_v24  ;;  %v4114_v23 = vld [vmem:[#allocation10 + $0x208] ss:$16 sps:$4 sm:$0xff]  }
 0x1ad   :  { %v989_v5 = vpop.f32.mrb[0].mxu0  ;;  %v1075_v6 = vpop.f32.mrb[0].mxu1 }
 0x1ae   :  { %v4527_v7 = vadd.f32 %v1075_v6, %v243_v0  ;;  %v991_v8 = vpop.f32.mrb[1].mxu0  ;;  %v1077_v9 = vpop.f32.mrb[1].mxu1  ;;  %v3563_v32 = vadd.f32 %v989_v5, %v235_v28 }
 0x1af   :  { %v993_v10 = vpop.f32.mrb[2].mxu0  ;;  %v1079_v11 = vpop.f32.mrb[2].mxu1  ;;  %v3564_v33 = vadd.f32 %v991_v8, %v239_v29  ;;  %v3568_v34 = vadd.f32 %v1077_v9, %v247_v30 }
 0x1b0   :  { %v4529_v14 = vadd.f32 %v1079_v11, %v243_v0  ;;  %v995_v15 = vpop.f32.mrb[3].mxu0  ;;  %v1081_v16 = vpop.f32.mrb[3].mxu1  ;;  %v3565_v35 = vadd.f32 %v993_v10, %v235_v28  ;;  %v1084_v42 = vmax.f32 %v3563_v32, 0.0  ;;  %v1086_v43 = vmax.f32 %v4527_v7, 0.0  ;;  %v4119_v28 = vld [vmem:[#allocation10 + $0x224] ss:$16 sps:$4 sm:$0xff]  }
 0x1b1   :  { %v3566_v38 = vadd.f32 %v995_v15, %v239_v29  ;;  %v3570_v39 = vadd.f32 %v1081_v16, %v247_v30  ;;  %v1085_v44 = vmax.f32 %v3564_v33, 0.0  ;;  %v1087_v45 = vmax.f32 %v3568_v34, 0.0  ;;  %v4122_v29 = vld [vmem:[#allocation10 + $0x22c] ss:$16 sps:$4 sm:$0xff]   ;;  %v4117_v30 = vld [vmem:[#allocation10 + $0x220] ss:$16 sps:$4 sm:$0xff]  }
 0x1b2   :  { %v1088_v48 = vmax.f32 %v3565_v35, 0.0  ;;  %v1090_v49 = vmax.f32 %v4529_v14, 0.0  ;;  %v4125_v32 = vld [vmem:[#allocation10 + $0x244] ss:$16 sps:$4 sm:$0xff]   ;;  %v4128_v33 = vld [vmem:[#allocation10 + $0x24c] ss:$16 sps:$4 sm:$0xff]  }
 0x1b3   :  { %v1089_v54 = vmax.f32 %v3566_v38, 0.0  ;;  %v1091_v55 = vmax.f32 %v3570_v39, 0.0  ;;  %v4123_v34 = vld [vmem:[#allocation10 + $0x240] ss:$16 sps:$4 sm:$0xff]   ;;  %v4126_v35 = vld [vmem:[#allocation10 + $0x248] ss:$16 sps:$4 sm:$0xff]  }
 0x1b4   :  { %v4129_v38 = vld [vmem:[#allocation10 + $0x260] ss:$16 sps:$4 sm:$0xff]   ;;  %v4132_v39 = vld [vmem:[#allocation10 + $0x268] ss:$16 sps:$4 sm:$0xff]  }
 0x22d   :  { %v1983_v46 = vpop.f32.mrb[4].mxu0  ;;  %v2069_v47 = vpop.f32.mrb[4].mxu1 }
 0x22e   :  { %v3571_v50 = vadd.f32 %v1983_v46, %v1229_v36  ;;  %v3575_v51 = vadd.f32 %v2069_v47, %v1237_v37  ;;  %v1985_v52 = vpop.f32.mrb[5].mxu0  ;;  %v2071_v53 = vpop.f32.mrb[5].mxu1  ;;  %v4141_v46 = vld [vmem:[#allocation10 + $0x2a0] ss:$16 sps:$4 sm:$0xff]   ;;  %v4144_v47 = vld [vmem:[#allocation10 + $0x2a8] ss:$16 sps:$4 sm:$0xff]  }
 0x22f   :  { %v3572_v56 = vadd.f32 %v1985_v52, %v1233_v40  ;;  %v3576_v57 = vadd.f32 %v2071_v53, %v1241_v41  ;;  %v1987_v58 = vpop.f32.mrb[6].mxu0  ;;  %v2073_v59 = vpop.f32.mrb[6].mxu1  ;;  %v4155_v52 = vld [vmem:[#allocation10 + $0x2e4] ss:$16 sps:$4 sm:$0xff]   ;;  %v4158_v53 = vld [vmem:[#allocation10 + $0x2ec] ss:$16 sps:$4 sm:$0xff]  }
 0x230   :  { %v2078_v60 = vmax.f32 %v3571_v50, 0.0  ;;  %v2080_v61 = vmax.f32 %v3575_v51, 0.0  ;;  %v3573_v63 = vadd.f32 %v1987_v58, %v1229_v36  ;;  %v3577_v0 = vadd.f32 %v2073_v59, %v1237_v37  ;;  %v1989_v1 = vpop.f32.mrb[7].mxu0  ;;  %v2075_v2 = vpop.f32.mrb[7].mxu1  ;;  %v4131_v36 = vld [vmem:[#allocation10 + $0x264] ss:$16 sps:$4 sm:$0xff]  }
 0x231   :  { %v2079_v3 = vmax.f32 %v3572_v56, 0.0  ;;  %v2081_v4 = vmax.f32 %v3576_v57, 0.0  ;;  %v3574_v5 = vadd.f32 %v1989_v1, %v1233_v40  ;;  %v3578_v6 = vadd.f32 %v2075_v2, %v1241_v41  ;;  %v4134_v37 = vld [vmem:[#allocation10 + $0x26c] ss:$16 sps:$4 sm:$0xff]   ;;  %v4137_v40 = vld [vmem:[#allocation10 + $0x284] ss:$16 sps:$4 sm:$0xff]  }
 0x232   :  { %v2086_v7 = vmul.f32 %v2078_v60, %v1084_v42  ;;  %v2088_v8 = vmul.f32 %v2080_v61, %v1086_v43  ;;  %v2082_v9 = vmax.f32 %v3573_v63, 0.0  ;;  %v2084_v10 = vmax.f32 %v3577_v0, 0.0  ;;  %v4140_v41 = vld [vmem:[#allocation10 + $0x28c] ss:$16 sps:$4 sm:$0xff]   ;;  %v4135_v42 = vld [vmem:[#allocation10 + $0x280] ss:$16 sps:$4 sm:$0xff]  }
 0x233   :  { %v2087_v11 = vmul.f32 %v2079_v3, %v1085_v44  ;;  %v2089_v12 = vmul.f32 %v2081_v4, %v1087_v45  ;;  %v2083_v13 = vmax.f32 %v3574_v5, 0.0  ;;  %v2085_v14 = vmax.f32 %v3578_v6, 0.0  ;;  %v4138_v43 = vld [vmem:[#allocation10 + $0x288] ss:$16 sps:$4 sm:$0xff]   ;;  %v4143_v44 = vld [vmem:[#allocation10 + $0x2a4] ss:$16 sps:$4 sm:$0xff]  }
 0x234   :  { %v2090_v15 = vmul.f32 %v2082_v9, %v1088_v48  ;;  %v2092_v16 = vmul.f32 %v2084_v10, %v1090_v49  ;;  %v4146_v45 = vld [vmem:[#allocation10 + $0x2ac] ss:$16 sps:$4 sm:$0xff]   ;;  %v4149_v48 = vld [vmem:[#allocation10 + $0x2c4] ss:$16 sps:$4 sm:$0xff]   ;;  %v4147_v50 = vld [vmem:[#allocation10 + $0x2c0] ss:$16 sps:$4 sm:$0xff]  }
 0x235   :  { %v2091_v17 = vmul.f32 %v2083_v13, %v1089_v54  ;;  %v2093_v18 = vmul.f32 %v2085_v14, %v1091_v55  ;;  %v4152_v49 = vld [vmem:[#allocation10 + $0x2cc] ss:$16 sps:$4 sm:$0xff]   ;;  %v4150_v51 = vld [vmem:[#allocation10 + $0x2c8] ss:$16 sps:$4 sm:$0xff]   ;;  %v4153_v54 = vld [vmem:[#allocation10 + $0x2e0] ss:$16 sps:$4 sm:$0xff]  }
 0x236   :  { %v2094_v19 = vpack.c.bf16 %v2090_v15, %v2086_v7  ;;  %v4549_v20 = vpack.c.bf16 %v2092_v16, %v2088_v8  ;;  %v4156_v55 = vld [vmem:[#allocation10 + $0x2e8] ss:$16 sps:$4 sm:$0xff]   ;;  %v4161_v56 = vld [vmem:[#allocation10 + $0x304] ss:$16 sps:$4 sm:$0xff]   ;;  %v4164_v57 = vld [vmem:[#allocation10 + $0x30c] ss:$16 sps:$4 sm:$0xff]  }
 0x237   :  { %v2095_v21 = vpack.c.bf16 %v2091_v17, %v2087_v11  ;;  %v2097_v24 = vpack.c.bf16 %v2093_v18, %v2089_v12  ;;  %v4159_v58 = vld [vmem:[#allocation10 + $0x300] ss:$16 sps:$4 sm:$0xff]   ;;  %v4162_v59 = vld [vmem:[#allocation10 + $0x308] ss:$16 sps:$4 sm:$0xff]   ;;  %v4167_v60 = vld [vmem:[#allocation10 + $0x324] ss:$16 sps:$4 sm:$0xff]  }
 0x238   :  { %v4170_v61 = vld [vmem:[#allocation10 + $0x32c] ss:$16 sps:$4 sm:$0xff]   ;;  %v4165_v63 = vld [vmem:[#allocation10 + $0x320] ss:$16 sps:$4 sm:$0xff]   ;;  %v4168_v0 = vld [vmem:[#allocation10 + $0x328] ss:$16 sps:$4 sm:$0xff]  }
 0x239   :  { %2920 = vmatprep.mubr.bf16.mxu0 %v2095_v21  ;;  %3006 = vmatprep.mubr.bf16.mxu1 %v2095_v21  ;;  %v4173_v1 = vld [vmem:[#allocation10 + $0x344] ss:$16 sps:$4 sm:$0xff]   ;;  %v4176_v2 = vld [vmem:[#allocation10 + $0x34c] ss:$16 sps:$4 sm:$0xff]   ;;  %v4171_v3 = vld [vmem:[#allocation10 + $0x340] ss:$16 sps:$4 sm:$0xff]  }
 0x23a   :  { %2921 = vmatmul.mubr.bf16.vlgmr.msra.gmra.mrb[8].mxu0 %v2094_v19  ;;  %3007 = vmatmul.mubr.bf16.vlgmr.msra.gmra.mrb[8].mxu1 %v2094_v19  ;;  %v4174_v4 = vld [vmem:[#allocation10 + $0x348] ss:$16 sps:$4 sm:$0xff]   ;;  %v4179_v5 = vld [vmem:[#allocation10 + $0x364] ss:$16 sps:$4 sm:$0xff]   ;;  %v4182_v6 = vld [vmem:[#allocation10 + $0x36c] ss:$16 sps:$4 sm:$0xff]  }
 0x23b   :  { %2932 = vmatpush1.bf16.msra.mxu0 %v4111_v22  ;;  %3018 = vmatpush1.bf16.msra.mxu1 %v4114_v23  ;;  %v4177_v7 = vld [vmem:[#allocation10 + $0x360] ss:$16 sps:$4 sm:$0xff]   ;;  %v4180_v8 = vld [vmem:[#allocation10 + $0x368] ss:$16 sps:$4 sm:$0xff]   ;;  %v4185_v9 = vld [vmem:[#allocation10 + $0x384] ss:$16 sps:$4 sm:$0xff]  }
 0x23c   :  { %2963 = vmatprep.mubr.bf16.mxu0 %v2097_v24  ;;  %3049 = vmatprep.mubr.bf16.mxu1 %v2097_v24  ;;  %v4188_v10 = vld [vmem:[#allocation10 + $0x38c] ss:$16 sps:$4 sm:$0xff]   ;;  %v4183_v11 = vld [vmem:[#allocation10 + $0x380] ss:$16 sps:$4 sm:$0xff]   ;;  %v4186_v12 = vld [vmem:[#allocation10 + $0x388] ss:$16 sps:$4 sm:$0xff]  }
 0x23d   :  { %2933 = vmatprep.subr.bf16.mxu0 %v4119_v28  ;;  %3019 = vmatprep.subr.bf16.mxu1 %v4122_v29  ;;  %v4191_v13 = vld [vmem:[#allocation10 + $0x3a4] ss:$16 sps:$4 sm:$0xff]   ;;  %v4194_v14 = vld [vmem:[#allocation10 + $0x3ac] ss:$16 sps:$4 sm:$0xff]   ;;  %v4189_v15 = vld [vmem:[#allocation10 + $0x3a0] ss:$16 sps:$4 sm:$0xff]  }
 0x23e   :  { %v4192_v16 = vld [vmem:[#allocation10 + $0x3a8] ss:$16 sps:$4 sm:$0xff]   ;;  %v4197_v17 = vld [vmem:[#allocation10 + $0x3c4] ss:$16 sps:$4 sm:$0xff]   ;;  %v4200_v18 = vld [vmem:[#allocation10 + $0x3cc] ss:$16 sps:$4 sm:$0xff]  }
 0x23f   :  { %2934 = vmatpush1.bf16.msra.mxu0 %v4117_v30  ;;  %3020 = vmatpush1.bf16.msra.mxu1 %v4120_v31  ;;  %v4195_v19 = vld [vmem:[#allocation10 + $0x3c0] ss:$16 sps:$4 sm:$0xff]   ;;  %v4198_v21 = vld [vmem:[#allocation10 + $0x3c8] ss:$16 sps:$4 sm:$0xff]   ;;  %v4203_v22 = vld [vmem:[#allocation10 + $0x3e4] ss:$16 sps:$4 sm:$0xff]  }
 0x240   :  { %2935 = vmatprep.subr.bf16.mxu0 %v4125_v32  ;;  %3021 = vmatprep.subr.bf16.mxu1 %v4128_v33  ;;  %v4206_v23 = vld [vmem:[#allocation10 + $0x3ec] ss:$16 sps:$4 sm:$0xff]   ;;  %v4201_v24 = vld [vmem:[#allocation10 + $0x3e0] ss:$16 sps:$4 sm:$0xff]   ;;  %v4204_v28 = vld [vmem:[#allocation10 + $0x3e8] ss:$16 sps:$4 sm:$0xff]  }
 0x241   :  { %v2226_v29 = vld [vmem:[%s4582_s7] sm:$0xf]  ;;  %s4386_s7 = smov [#allocation11]  }
 0x242   :  { %v2231_v30 = vrot.slane %v2226_v29, %v4531_v25  ;;  %v2239_v31 = vrot.slane %v2226_v29, %v4521_v62  ;;  %v2235_v32 = vrot.slane %v2226_v29, %v4533_v26  ;;  %v2243_v33 = vrot.slane %v2226_v29, %v4535_v27  ;;  %s3141_s24 = sshll.u32 %s4386_s7, 4  ;;  %s3142_s24 = int_to_ptr.vmem [resolvable:$true] %s3141_s24 }
 0x243   :  { %2936 = vmatpush1.bf16.msra.mxu0 %v4123_v34  ;;  %3022 = vmatpush1.bf16.msra.mxu1 %v4126_v35  ;;  %s4349_s25 = scalar_lea.vmem %s3142_s24, 512  ;;  %p4354_p13 = scmp.lt.s32.totalorder %s3142_s24, %s3142_s24 }
 0x244   :  { %2937 = vmatprep.subr.bf16.mxu0 %v4131_v36  ;;  %3023 = vmatprep.subr.bf16.mxu1 %v4134_v37  ;;  %p4350_p12 = scmp.ne.s32.totalorder %s3142_s24, %s4349_s25  ;;  %p4355_p0 = scmp.lt.s32.totalorder %s4349_s25, %s4349_s25 }
 0x246   :  { %p4356_p1 = por %p4355_p0, %p4354_p13 }
 0x247   :  { %2938 = vmatpush1.bf16.msra.mxu0 %v4129_v38  ;;  %3024 = vmatpush1.bf16.msra.mxu1 %v4132_v39 }
 0x248   :  { %2939 = vmatprep.subr.bf16.mxu0 %v4137_v40  ;;  %3025 = vmatprep.subr.bf16.mxu1 %v4140_v41  ;;  %p4357_p2 = pnand %p4356_p1, %p4350_p12 }
 0x24b   :  { %2940 = vmatpush1.bf16.msra.mxu0 %v4135_v42  ;;  %3026 = vmatpush1.bf16.msra.mxu1 %v4138_v43 }
 0x24c   :  { %2941 = vmatprep.subr.bf16.mxu0 %v4143_v44  ;;  %3027 = vmatprep.subr.bf16.mxu1 %v4146_v45 }
 0x24f   :  { %2942 = vmatpush1.bf16.msra.mxu0 %v4141_v46  ;;  %3028 = vmatpush1.bf16.msra.mxu1 %v4144_v47 }
 0x250   :  { %2943 = vmatprep.subr.bf16.mxu0 %v4149_v48  ;;  %3029 = vmatprep.subr.bf16.mxu1 %v4152_v49 }
 0x253   :  { %2944 = vmatpush1.bf16.msra.mxu0 %v4147_v50  ;;  %3030 = vmatpush1.bf16.msra.mxu1 %v4150_v51 }
 0x254   :  { %2945 = vmatprep.subr.bf16.mxu0 %v4155_v52  ;;  %3031 = vmatprep.subr.bf16.mxu1 %v4158_v53 }
 0x257   :  { %2946 = vmatpush1.bf16.msra.mxu0 %v4153_v54  ;;  %3032 = vmatpush1.bf16.msra.mxu1 %v4156_v55 }
 0x258   :  { %2947 = vmatprep.subr.bf16.mxu0 %v4161_v56  ;;  %3033 = vmatprep.subr.bf16.mxu1 %v4164_v57 }
 0x25b   :  { %2948 = vmatpush1.bf16.msra.mxu0 %v4159_v58  ;;  %3034 = vmatpush1.bf16.msra.mxu1 %v4162_v59 }
 0x25c   :  { %2949 = vmatprep.subr.bf16.mxu0 %v4167_v60  ;;  %3035 = vmatprep.subr.bf16.mxu1 %v4170_v61 }
 0x25f   :  { %2950 = vmatpush1.bf16.msra.mxu0 %v4165_v63  ;;  %3036 = vmatpush1.bf16.msra.mxu1 %v4168_v0 }
 0x260   :  { %2951 = vmatprep.subr.bf16.mxu0 %v4173_v1  ;;  %3037 = vmatprep.subr.bf16.mxu1 %v4176_v2 }
 0x263   :  { %2952 = vmatpush1.bf16.msra.mxu0 %v4171_v3  ;;  %3038 = vmatpush1.bf16.msra.mxu1 %v4174_v4 }
 0x264   :  { %2953 = vmatprep.subr.bf16.mxu0 %v4179_v5  ;;  %3039 = vmatprep.subr.bf16.mxu1 %v4182_v6 }
 0x267   :  { %2954 = vmatpush1.bf16.msra.mxu0 %v4177_v7  ;;  %3040 = vmatpush1.bf16.msra.mxu1 %v4180_v8 }
 0x268   :  { %2955 = vmatprep.subr.bf16.mxu0 %v4185_v9  ;;  %3041 = vmatprep.subr.bf16.mxu1 %v4188_v10 }
 0x26b   :  { %2956 = vmatpush1.bf16.msra.mxu0 %v4183_v11  ;;  %3042 = vmatpush1.bf16.msra.mxu1 %v4186_v12 }
 0x26c   :  { %2957 = vmatprep.subr.bf16.mxu0 %v4191_v13  ;;  %3043 = vmatprep.subr.bf16.mxu1 %v4194_v14 }
 0x26f   :  { %2958 = vmatpush1.bf16.msra.mxu0 %v4189_v15  ;;  %3044 = vmatpush1.bf16.msra.mxu1 %v4192_v16 }
 0x270   :  { %2959 = vmatprep.subr.bf16.mxu0 %v4197_v17  ;;  %3045 = vmatprep.subr.bf16.mxu1 %v4200_v18 }
 0x273   :  { %2960 = vmatpush1.bf16.msra.mxu0 %v4195_v19  ;;  %3046 = vmatpush1.bf16.msra.mxu1 %v4198_v21 }
 0x274   :  { %2961 = vmatprep.subr.bf16.mxu0 %v4203_v22  ;;  %3047 = vmatprep.subr.bf16.mxu1 %v4206_v23 }
 0x277   :  { %2962 = vmatpush1.bf16.msra.mxu0 %v4201_v24  ;;  %3048 = vmatpush1.bf16.msra.mxu1 %v4204_v28 }
 0x27a   :  { %2964 = vmatmul.mubr.bf16.vlgmr.msra.gmra.mrb[8].mxu0 %v4549_v20  ;;  %3050 = vmatmul.mubr.bf16.vlgmr.msra.gmra.mrb[8].mxu1 %v4549_v20 }
 0x34d   :  { %v2965_v34 = vpop.f32.mrb[8].mxu0  ;;  %v3051_v35 = vpop.f32.mrb[8].mxu1 }
 0x34e   :  { %v3579_v36 = vadd.f32 %v2965_v34, %v2231_v30  ;;  %v3583_v37 = vadd.f32 %v3051_v35, %v2239_v31  ;;  %v2967_v38 = vpop.f32.mrb[9].mxu0  ;;  %v3053_v39 = vpop.f32.mrb[9].mxu1 }
 0x34f   :  { %v3580_v40 = vadd.f32 %v2967_v38, %v2235_v32  ;;  %v3584_v20 = vadd.f32 %v3053_v39, %v2243_v33  ;;  %v2969_v41 = vpop.f32.mrb[10].mxu0  ;;  %v3055_v42 = vpop.f32.mrb[10].mxu1 }
 0x350   :  { %v3547_v43 = vmul.f32 -1.442695, %v3579_v36  ;;  %v3549_v44 = vmul.f32 -1.442695, %v3583_v37  ;;  %v3581_v45 = vadd.f32 %v2969_v41, %v2231_v30  ;;  %v3585_v25 = vadd.f32 %v3055_v42, %v2239_v31  ;;  %v2971_v46 = vpop.f32.mrb[11].mxu0  ;;  %v3057_v62 = vpop.f32.mrb[11].mxu1 }
 0x351   :  { %v3548_v47 = vmul.f32 -1.442695, %v3580_v40  ;;  %v3550_v26 = vmul.f32 -1.442695, %v3584_v20  ;;  %v3582_v48 = vadd.f32 %v2971_v46, %v2235_v32  ;;  %v3586_v27 = vadd.f32 %v3057_v62, %v2243_v33 }
 0x352   :  { %4207 = vpow2.f32 %v3547_v43  ;;  %v3551_v49 = vmul.f32 -1.442695, %v3581_v45  ;;  %v3553_v50 = vmul.f32 -1.442695, %v3585_v25 }
 0x353   :  { %4209 = vpow2.f32 %v3549_v44  ;;  %v3552_v51 = vmul.f32 -1.442695, %v3582_v48  ;;  %v3554_v52 = vmul.f32 -1.442695, %v3586_v27 }
 0x354   :  { %4211 = vpow2.f32 %v3548_v47 }
 0x355   :  { %4213 = vpow2.f32 %v3550_v26 }
 0x356   :  { %4215 = vpow2.f32 %v3551_v49 }
 0x357   :  { %4217 = vpow2.f32 %v3553_v50 }
 0x358   :  { %4219 = vpow2.f32 %v3552_v51 }
 0x359   :  { %4221 = vpow2.f32 %v3554_v52 }
 0x35c   :  { %v4208_v53 = vpop.eup %4207 }
 0x35d   :  { %v4210_v54 = vpop.eup %4209  ;;  %v3084_v55 = vadd.f32 1.0, %v4208_v53 }
 0x35e   :  { %v4212_v56 = vpop.eup %4211  ;;  %v3086_v57 = vadd.f32 1.0, %v4210_v54 }
 0x35f   :  { %v4214_v58 = vpop.eup %4213  ;;  %4223 = vrcp.f32 %v3084_v55  ;;  %v3085_v59 = vadd.f32 1.0, %v4212_v56 }
 0x360   :  { %v4216_v60 = vpop.eup %4215  ;;  %4225 = vrcp.f32 %v3086_v57  ;;  %v3087_v61 = vadd.f32 1.0, %v4214_v58 }
 0x361   :  { %v4218_v63 = vpop.eup %4217  ;;  %4227 = vrcp.f32 %v3085_v59  ;;  %v3088_v0 = vadd.f32 1.0, %v4216_v60 }
 0x362   :  { %v4220_v1 = vpop.eup %4219  ;;  %4229 = vrcp.f32 %v3087_v61  ;;  %v3090_v2 = vadd.f32 1.0, %v4218_v63 }
 0x363   :  { %v4222_v3 = vpop.eup %4221  ;;  %4231 = vrcp.f32 %v3088_v0  ;;  %v3089_v4 = vadd.f32 1.0, %v4220_v1 }
 0x364   :  { %4233 = vrcp.f32 %v3090_v2  ;;  %v3091_v5 = vadd.f32 1.0, %v4222_v3 }
 0x365   :  { %4235 = vrcp.f32 %v3089_v4 }
 0x366   :  { %4237 = vrcp.f32 %v3091_v5 }
 0x369   :  { %v4224_v6 = vpop.eup %4223 }
 0x36a   :  { %v4226_v7 = vpop.eup %4225 }
 0x36b   :  { %v4228_v8 = vpop.eup %4227 }
 0x36c   :  { %v4230_v9 = vpop.eup %4229  ;;  %v3559_v10 = vpack.c.bf16 %v4228_v8, %v4224_v6 }
 0x36d   :  { %v4232_v11 = vpop.eup %4231  ;;  %v3560_v12 = vpack.c.bf16 %v4230_v9, %v4226_v7 }
 0x36e   :  { %v4234_v13 = vpop.eup %4233  ;;  %3132 = vst [vmem:[#allocation11] sm:$0xff] %v3559_v10 }
 0x36f   :  { %v4236_v14 = vpop.eup %4235  ;;  %3133 = vst [vmem:[#allocation11 + $0x8] sm:$0xff] %v3560_v12 }
 0x370   :  { %v4238_v15 = vpop.eup %4237  ;;  %v3561_v16 = vpack.c.bf16 %v4236_v14, %v4232_v11 }
 0x371   :  { %v3562_v17 = vpack.c.bf16 %v4238_v15, %v4234_v13 }
 0x372   :  { %3134 = vst [vmem:[#allocation11 + $0x10] sm:$0xff] %v3561_v16 }
 0x373   :  { %3135 = vst [vmem:[#allocation11 + $0x18] sm:$0xff] %v3562_v17 }
 0x374   :  { %4360 = shalt.err (!%p4357_p2)
}
 0x375   :  { %s4361_s29 = scalar_lea.hbm %s4583_s8, 512 }
 0x376   :  { %p4362_p3 = scmp.ne.s32.totalorder %s4583_s8, %s4361_s29  ;;  %p4365_p4 = scmp.lt.u32.totalorder %s4361_s29, %s4583_s8 }
 0x378   :  { %p4367_p5 = pnand %p4365_p4, %p4362_p3 }
 0x37a   :  { %4370 = shalt.err (!%p4367_p5)
}
 0x37b   :  { %3147 = dma.vmem_to_hbm [thread:$0]  %s3142_s24, 512, %s4583_s8, [#allocation4], %s4381_s17, %s4381_s17, %s4382_s18  }
 0x37c   :  { %4377 = dma.done.wait [#allocation4], 512  }
 0x37d   :  { %4378 = vsyncadd [#allocation4], 4294966784 }
 0x37e   :  { %3151 = vsyncpa [#allocation3], 1 }
 0x37f   :  { %3152 = vsyncpa [#allocation6], 1 }
 0x380   :  { %3153 = vsyncpa [#allocation9], 1 }
 0x381   :  { %3154 = vsyncpa [#allocation4], 1 }

</bundles_post_ra>
